<compile_context>
chip_gen: v7x
topology: tpu7x:2x2x1
jax: 0.10.0
libtpu: 0.0.40
codegen_flags: <defaults>
</compile_context>

<pallas_src>
import math

import jax
import jax.numpy as jnp
from jax.experimental import pallas as pl
from jax.experimental.pallas import tpu as pltpu

CHANNELS = [64, 64, 64, 128, 256, 512]
BN_EPS = 1e-5


def _round_up(a, b):
    return -(-a // b) * b


# ----------------------------------------------------------------------------
# Generation-aware VMEM caps (v5e/v6e: 128 MiB/core, v7x: 64 MiB/core)
# ----------------------------------------------------------------------------
def _tpu_vmem_capacity():
    try:
        info = pltpu.get_tpu_info()
        cap = getattr(info, "vmem_capacity_bytes", None)
        if cap:
            return int(cap)
    except Exception:
        pass
    return 64 << 20  # conservative default (v7x per-TensorCore)


_VMEM_CAP = _tpu_vmem_capacity()
if _VMEM_CAP >= (96 << 20):          # v5e / v6e (128 MiB per core)
    _VMEM_LIMIT = 96 << 20
    _TILE_BUDGET = 64 << 20
    _MAX_TM = 2048
else:                                # v7x (64 MiB per core)
    _VMEM_LIMIT = 48 << 20
    _TILE_BUDGET = 28 << 20
    _MAX_TM = 1024


# ----------------------------------------------------------------------------
# Kernel 1: conv1x1 (no bias, BN scale pre-folded) + shift + ReLU
# ----------------------------------------------------------------------------
def _conv1x1_bn_relu_kernel(x_ref, w_ref, shift_ref, o_ref):
    # x_ref: (TM, Cin), w_ref: (Cin, Cout) bf16 (BN scale folded in),
    # shift_ref: (1, Cout) f32, o_ref: (TM, Cout).
    x = x_ref[...].astype(jnp.bfloat16)
    y = jnp.dot(x, w_ref[...], preferred_element_type=jnp.float32)
    o_ref[...] = jnp.maximum(y + shift_ref[...], 0.0).astype(o_ref.dtype)


def conv1x1_bn_relu(x_nhwc, w_bf16, shift, out_dtype=jnp.bfloat16):
    N, H, W, C = x_nhwc.shape
    Cout = w_bf16.shape[1]
    M = N * H * W
    x2d = x_nhwc.reshape(M, C)

    # Lane-dense packing for narrow channel counts (the 64-channel levels):
    # r pixels per matmul row with a block-diagonal (r*C, r*Cout) weight, so the
    # output stores use all 128 lanes and the MXU K dim is fuller.
    r = 1
    if C == Cout and Cout < 128 and 128 % Cout == 0:
        rr = 128 // Cout
        if M % rr == 0:
            r = rr
    if r > 1:
        x2d = x2d.reshape(M // r, r * C)                         # free reshape
        w_bf16 = jnp.kron(jnp.eye(r, dtype=w_bf16.dtype), w_bf16)  # block-diag
        shift = jnp.tile(shift, (1, r))

    Mr, Cin_p = x2d.shape
    Cout_p = r * Cout

    # HBM-bound path: large row tiles amortize per-step overhead.  No padding /
    # slicing: partial last block is padded on load and masked on store.
    tm = min(_MAX_TM, _round_up(Mr, 8))
    grid_m = pl.cdiv(Mr, tm)

    out2d = pl.pallas_call(
        _conv1x1_bn_relu_kernel,
        out_shape=jax.ShapeDtypeStruct((Mr, Cout_p), out_dtype),
        grid_spec=pltpu.PrefetchScalarGridSpec(
            num_scalar_prefetch=0,
            grid=(grid_m,),
            in_specs=[
                pl.BlockSpec((tm, Cin_p), lambda i: (i, 0)),
                pl.BlockSpec((Cin_p, Cout_p), lambda i: (0, 0)),
                pl.BlockSpec((1, Cout_p), lambda i: (0, 0)),
            ],
            out_specs=pl.BlockSpec((tm, Cout_p), lambda i: (i, 0)),
        ),
        compiler_params=pltpu.CompilerParams(
            dimension_semantics=("parallel",),
            vmem_limit_bytes=_VMEM_LIMIT,
        ),
    )(x2d, w_bf16, shift)
    return out2d.reshape(N, H, W, Cout)


# ----------------------------------------------------------------------------
# Kernel 2: conv3x3 (pad=1, no bias) with the trailing 1x1 folded into the taps
# ----------------------------------------------------------------------------
def _conv3x3_fused_kernel(x_ref, xup_ref, xdn_ref, w_ref, o_ref, xp_ref):
    # x_ref:   (1, TH, Wp, C)      center rows of this tile (input dtype)
    # xup_ref: (1, 1, Wp, C)       row just above (clamped; zeroed at top edge)
    # xdn_ref: (1, 1, Wp, C)       row just below (clamped; zeroed at bottom edge)
    # w_ref:   (9, C, C) bf16      fused taps (w3[tap] @ w1), layout (Cin, Cout)
    # o_ref:   (1, TH, Wp, C)
    # xp_ref:  (TH+2, Wp+2, C) bf16  zero-padded tile (VMEM scratch)
    TH, Wp, C = o_ref.shape[1], o_ref.shape[2], o_ref.shape[3]
    i = pl.program_id(1)
    last = pl.num_programs(1) - 1

    # Interior is always overwritten; only the halo rows (at the image edges) and
    # the two border columns are zero-filled -> no full-tile memset per step.
    xp_ref[1:TH + 1, 1:Wp + 1, :] = x_ref[0].astype(xp_ref.dtype)

    @pl.when(i == 0)
    def _():
        xp_ref[0:1, :, :] = jnp.zeros((1, Wp + 2, C), xp_ref.dtype)

    @pl.when(i > 0)
    def _():
        xp_ref[0:1, 1:Wp + 1, :] = xup_ref[0].astype(xp_ref.dtype)

    @pl.when(i == last)
    def _():
        xp_ref[TH + 1:TH + 2, :, :] = jnp.zeros((1, Wp + 2, C), xp_ref.dtype)

    @pl.when(i < last)
    def _():
        xp_ref[TH + 1:TH + 2, 1:Wp + 1, :] = xdn_ref[0].astype(xp_ref.dtype)

    # Left/right zero-padding columns (2*(TH+2)*C elements; cheap).
    xp_ref[:, 0:1, :] = jnp.zeros((TH + 2, 1, C), xp_ref.dtype)
    xp_ref[:, Wp + 1:Wp + 2, :] = jnp.zeros((TH + 2, 1, C), xp_ref.dtype)

    # 9 shifted bf16 matmuls, accumulated as a chained sum of dots (no VMEM
    # accumulator round-trip; Mosaic keeps the f32 accumulation in regs / MRB).
    # One sublane realignment per dw; the ((TH+2), Wp, C) -> ((TH+2)*Wp, C) merge
    # is (8,128)-aligned because Wp % 8 == 0, and the per-dh row slices are free.
    # TODO(synk): for C=64 (MXU K under-filled on v6e/v7x) the 9 taps could be
    #             concatenated along K into one (m, 9C) x (9C, C) matmul.
    acc = None
    for dw in range(3):
        xw = xp_ref[:, dw:dw + Wp, :].reshape((TH + 2) * Wp, C)
        for dh in range(3):
            win = xw[dh * Wp: dh * Wp + TH * Wp]
            t = jnp.dot(win, w_ref[dh * 3 + dw],
                        preferred_element_type=jnp.float32)
            acc = t if acc is None else acc + t
    o_ref[0] = acc.reshape(TH, Wp, C).astype(o_ref.dtype)


def _pick_row_tile(H, Wp, C, in_bytes, out_bytes):
    # Largest row-tile dividing H that fits the generation-aware VMEM budget
    # (bigger tiles amortize the ~0.35us/step overhead and the 2/TH halo refetch).
    best = 1
    for th in range(1, H + 1):
        if H % th:
            continue
        m = th * Wp
        vmem = (2 * m * C * in_bytes                 # center input, double buffered
                + 2 * m * C * out_bytes              # output, double buffered
                + 4 * Wp * C * in_bytes              # 2 halo rows x 2 buffers
                + 2 * 9 * C * C * 2                  # fused bf16 weights x 2 buffers
                + (th + 2) * (Wp + 2) * C * 2        # bf16 padded scratch
                + (th + 2) * Wp * C * 2              # one realigned dw slice (bf16)
                + 2 * m * C * 4)                     # f32 accumulation temporaries
        if vmem > _TILE_BUDGET:
            break
        best = th
    return best


def conv3x3_then_1x1(x_nhwc, w3f_bf16, out_dtype=jnp.bfloat16):
    N, H, W, C = x_nhwc.shape
    # Keep the in-kernel row-merge (8,128)-aligned: pad the image width to a
    # multiple of 8 (only when needed).  The zero columns double as the conv's
    # right-edge padding, so the real output columns stay exact.
    Wp = max(_round_up(W, 8), 8)
    if Wp != W:
        x_nhwc = jnp.pad(x_nhwc, ((0, 0), (0, 0), (0, Wp - W), (0, 0)))

    th = _pick_row_tile(H, Wp, C, x_nhwc.dtype.itemsize, jnp.dtype(out_dtype).itemsize)
    n_tiles = H // th

    out = pl.pallas_call(
        _conv3x3_fused_kernel,
        out_shape=jax.ShapeDtypeStruct((N, H, Wp, C), out_dtype),
        grid_spec=pltpu.PrefetchScalarGridSpec(
            num_scalar_prefetch=0,
            grid=(N, n_tiles),
            in_specs=[
                pl.BlockSpec((1, th, Wp, C), lambda n, i: (n, i, 0, 0)),
                # halo rows: 1-row blocks at clamped element-row indices
                pl.BlockSpec((1, 1, Wp, C),
                             lambda n, i: (n, jnp.maximum(i * th - 1, 0), 0, 0)),
                pl.BlockSpec((1, 1, Wp, C),
                             lambda n, i: (n, jnp.minimum(i * th + th, H - 1), 0, 0)),
                # TODO(synk): grid-invariant weights; on v7x single-buffering this
                #             block (pipeline_mode=pl.Buffered(1)) would reclaim
                #             ~9*C*C*2 bytes of VMEM for a larger row tile.
                pl.BlockSpec((9, C, C), lambda n, i: (0, 0, 0)),
            ],
            out_specs=pl.BlockSpec((1, th, Wp, C), lambda n, i: (n, i, 0, 0)),
            scratch_shapes=[
                pltpu.VMEM((th + 2, Wp + 2, C), jnp.bfloat16),
            ],
        ),
        compiler_params=pltpu.CompilerParams(
            dimension_semantics=("parallel", "parallel"),
            vmem_limit_bytes=_VMEM_LIMIT,
        ),
    )(x_nhwc, x_nhwc, x_nhwc, w3f_bf16)
    if Wp != W:
        out = out[:, :, :W, :]
    return out


# ----------------------------------------------------------------------------
# Parameters (deterministic init; shapes match Connectors.__init__)
# ----------------------------------------------------------------------------
def init_params(key):
    params_norm = []    # connector1_i: (w1x1*bn_scale bf16 (C,C), bn_shift f32 (1,C))
    params_nonorm = []  # connector2_i: (w3f bf16 (9,C,C),)  fused 3x3*1x1 taps
    for i, C in enumerate(CHANNELS):
        k = jax.random.fold_in(key, i)
        k1, k2, k3, k4, k5, k6, k7 = jax.random.split(k, 7)
        w1x1 = jax.random.normal(k1, (C, C), jnp.float32) * (1.0 / math.sqrt(C))
        gamma = 1.0 + 0.1 * jax.random.normal(k2, (C,), jnp.float32)
        beta = 0.1 * jax.random.normal(k3, (C,), jnp.float32)
        running_mean = 0.1 * jax.random.normal(k4, (C,), jnp.float32)
        running_var = jnp.abs(jax.random.normal(k5, (C,), jnp.float32)) + 0.5
        scale = gamma / jnp.sqrt(running_var + BN_EPS)
        shift = beta - running_mean * scale
        # Fold the eval-mode BN per-channel scale into the 1x1 weight columns.
        w_scaled = (w1x1 * scale[None, :]).astype(jnp.bfloat16)
        w3 = jax.random.normal(k6, (9, C, C), jnp.float32) * (1.0 / math.sqrt(9 * C))
        w1 = jax.random.normal(k7, (C, C), jnp.float32) * (1.0 / math.sqrt(C))
        # Fold the trailing 1x1 into the 3x3 taps (both linear): w3f[t] = w3[t] @ w1.
        w3f = jnp.einsum('tij,jk->tik', w3, w1).astype(jnp.bfloat16)
        params_norm.append((w_scaled, shift.reshape(1, C)))
        params_nonorm.append((w3f,))
    return params_norm, params_nonorm


# ----------------------------------------------------------------------------
# Module forward
# ----------------------------------------------------------------------------
def branch_outputs(params, xs, flag, out_dtype=jnp.bfloat16):
    params_norm, params_nonorm = params
    if flag == 'f':     # forward_no_norm: connector2_i = conv3x3 -> conv1x1 (fused)
        return tuple(
            conv3x3_then_1x1(x, *params_nonorm[i], out_dtype=out_dtype)
            for i, x in enumerate(xs)
        )
    elif flag == 'a':   # forward_norm: connector1_i = conv1x1 -> BN -> ReLU
        return tuple(
            conv1x1_bn_relu(x, *params_norm[i], out_dtype=out_dtype)
            for i, x in enumerate(xs)
        )
    raise ValueError(flag)


def connectors_forward(params, xs, flag):
    # Exact reference semantics: branches are evaluated, but the ORIGINAL input
    # tuple is returned (the reference forward only reassigns locals).  Under jit
    # the branch work is DCE'd -- benchmark branch_outputs instead.
    _ = branch_outputs(params, xs, flag)
    return xs


if __name__ == "__main__":
    key = jax.random.PRNGKey(0)
    params = init_params(key)
    params_norm, params_nonorm = params

    N, H, W = 2, 8, 8
    xs = tuple(
        jax.random.normal(jax.random.fold_in(key, 100 + i), (N, H, W, C), jnp.float32)
        for i, C in enumerate(CHANNELS)
    )

    out_f = branch_outputs(params, xs, 'f')   # connector2_* hot path (Pallas)
    out_a = branch_outputs(params, xs, 'a')   # connector1_* hot path (Pallas)
    jax.block_until_ready((out_f, out_a))

    ret = connectors_forward(params, xs, 'f')  # matches reference: returns xs
    jax.block_until_ready(ret)

    # Light correctness check on a ragged shape (exercises the partial-last-block
    # masking in the 1x1 kernel and the width-padding path in the 3x3 kernel).
    C0 = CHANNELS[0]
    xr = jax.random.normal(jax.random.fold_in(key, 999), (1, 5, 6, C0), jnp.float32)

    w_n, sh = params_norm[0]
    ref1 = jnp.maximum(
        jnp.einsum('nhwc,cd->nhwd', xr, w_n.astype(jnp.float32)) + sh.reshape(-1), 0.0)
    out1 = conv1x1_bn_relu(xr, w_n, sh).astype(jnp.float32)
    err1 = float(jnp.max(jnp.abs(out1 - ref1)))
    assert err1 < 0.2, f"conv1x1_bn_relu mismatch: {err1}"

    (w3f0,) = params_nonorm[0]
    xpad = jnp.pad(xr, ((0, 0), (1, 1), (1, 1), (0, 0)))
    ref2 = sum(
        jnp.einsum('nhwc,cd->nhwd',
                   xpad[:, dh:dh + 5, dw:dw + 6, :],
                   w3f0[dh * 3 + dw].astype(jnp.float32))
        for dh in range(3) for dw in range(3))
    out2 = conv3x3_then_1x1(xr, w3f0).astype(jnp.float32)
    err2 = float(jnp.max(jnp.abs(out2 - ref2)))
    assert err2 < 0.2, f"conv3x3_then_1x1 mismatch: {err2}"

    print("KERNEL_OK")
</pallas_src>

<mosaic_0001>
module attributes {stable_mosaic.version = 11 : i64} {
  func.func @_conv3x3_fused_kernel(%arg0: i32, %arg1: i32, %arg2: memref<1x8x8x64xf32, #tpu.memory_space<vmem>>, %arg3: memref<1x1x8x64xf32, #tpu.memory_space<vmem>>, %arg4: memref<1x1x8x64xf32, #tpu.memory_space<vmem>>, %arg5: memref<9x64x64xbf16, #tpu.memory_space<vmem>>, %arg6: memref<1x8x8x64xbf16, #tpu.memory_space<vmem>>, %arg7: memref<10x10x64xbf16, #tpu.memory_space<vmem>>) attributes {dimension_semantics = [#tpu.dimension_semantics<parallel>, #tpu.dimension_semantics<parallel>], iteration_bounds = array<i64: 2, 1>, scalar_prefetch = 0 : i64, scratch_operands = 1 : i64, tpu.core_type = #tpu.core_type<tc>, window_params = [{transform_indices = @transform_0, window_bounds = array<i64: 1, 8, 8, 64>}, {transform_indices = @transform_1, window_bounds = array<i64: 1, 1, 8, 64>}, {transform_indices = @transform_2, window_bounds = array<i64: 1, 1, 8, 64>}, {pipeline_mode = #tpu.pipeline_mode<synchronous>, transform_indices = @transform_3, window_bounds = array<i64: 9, 64, 64>}, {transform_indices = @transform_4, window_bounds = array<i64: 1, 8, 8, 64>}]} {
    %c0 = arith.constant 0 : index
    %c0_0 = arith.constant 0 : index
    %c0_1 = arith.constant 0 : index
    %c0_2 = arith.constant 0 : index
    %0 = vector.load %arg2[%c0, %c0_0, %c0_1, %c0_2] : memref<1x8x8x64xf32, #tpu.memory_space<vmem>>, vector<1x8x8x64xf32>
    %1 = vector.shape_cast %0 : vector<1x8x8x64xf32> to vector<8x8x64xf32>
    %2 = arith.truncf %1 : vector<8x8x64xf32> to vector<8x8x64xbf16>
    %c1 = arith.constant 1 : index
    %c1_3 = arith.constant 1 : index
    %c0_4 = arith.constant 0 : index
    %3 = vector.load %arg7[%c1, %c1_3, %c0_4] : memref<10x10x64xbf16, #tpu.memory_space<vmem>>, vector<8x8x64xbf16>
    tpu.vector_store %arg7[%c1, %c1_3, %c0_4], %2 {strides = array<i32>} : memref<10x10x64xbf16, #tpu.memory_space<vmem>>, vector<8x8x64xbf16>,
    %c0_i32 = arith.constant 0 : i32
    %4 = arith.cmpi eq, %arg1, %c0_i32 : i32
    %5 = arith.extui %4 : i1 to i32
    %c0_i32_5 = arith.constant 0 : i32
    %6 = arith.cmpi ne, %5, %c0_i32_5 : i32
    scf.if %6 {
      %cst_60 = arith.constant 0.000000e+00 : bf16
      %75 = vector.broadcast %cst_60 : bf16 to vector<1x10x64xbf16>
      %c0_61 = arith.constant 0 : index
      %c0_62 = arith.constant 0 : index
      %c0_63 = arith.constant 0 : index
      %76 = vector.load %arg7[%c0_61, %c0_62, %c0_63] : memref<10x10x64xbf16, #tpu.memory_space<vmem>>, vector<1x10x64xbf16>
      tpu.vector_store %arg7[%c0_61, %c0_62, %c0_63], %75 {strides = array<i32>} : memref<10x10x64xbf16, #tpu.memory_space<vmem>>, vector<1x10x64xbf16>,
    } else {
    }
    %c0_i32_6 = arith.constant 0 : i32
    %7 = arith.cmpi sgt, %arg1, %c0_i32_6 : i32
    %8 = arith.extui %7 : i1 to i32
    %c0_i32_7 = arith.constant 0 : i32
    %9 = arith.cmpi ne, %8, %c0_i32_7 : i32
    scf.if %9 {
      %c0_60 = arith.constant 0 : index
      %c0_61 = arith.constant 0 : index
      %c0_62 = arith.constant 0 : index
      %c0_63 = arith.constant 0 : index
      %75 = vector.load %arg3[%c0_60, %c0_61, %c0_62, %c0_63] : memref<1x1x8x64xf32, #tpu.memory_space<vmem>>, vector<1x1x8x64xf32>
      %76 = vector.shape_cast %75 : vector<1x1x8x64xf32> to vector<1x8x64xf32>
      %77 = arith.truncf %76 : vector<1x8x64xf32> to vector<1x8x64xbf16>
      %c0_64 = arith.constant 0 : index
      %c1_65 = arith.constant 1 : index
      %c0_66 = arith.constant 0 : index
      %78 = vector.load %arg7[%c0_64, %c1_65, %c0_66] : memref<10x10x64xbf16, #tpu.memory_space<vmem>>, vector<1x8x64xbf16>
      tpu.vector_store %arg7[%c0_64, %c1_65, %c0_66], %77 {strides = array<i32>} : memref<10x10x64xbf16, #tpu.memory_space<vmem>>, vector<1x8x64xbf16>,
    } else {
    }
    %c0_i32_8 = arith.constant 0 : i32
    %10 = arith.cmpi eq, %arg1, %c0_i32_8 : i32
    %11 = arith.extui %10 : i1 to i32
    %c0_i32_9 = arith.constant 0 : i32
    %12 = arith.cmpi ne, %11, %c0_i32_9 : i32
    scf.if %12 {
      %cst_60 = arith.constant 0.000000e+00 : bf16
      %75 = vector.broadcast %cst_60 : bf16 to vector<1x10x64xbf16>
      %c9_61 = arith.constant 9 : index
      %c0_62 = arith.constant 0 : index
      %c0_63 = arith.constant 0 : index
      %76 = vector.load %arg7[%c9_61, %c0_62, %c0_63] : memref<10x10x64xbf16, #tpu.memory_space<vmem>>, vector<1x10x64xbf16>
      tpu.vector_store %arg7[%c9_61, %c0_62, %c0_63], %75 {strides = array<i32>} : memref<10x10x64xbf16, #tpu.memory_space<vmem>>, vector<1x10x64xbf16>,
    } else {
    }
    %c0_i32_10 = arith.constant 0 : i32
    %13 = arith.cmpi slt, %arg1, %c0_i32_10 : i32
    %14 = arith.extui %13 : i1 to i32
    %c0_i32_11 = arith.constant 0 : i32
    %15 = arith.cmpi ne, %14, %c0_i32_11 : i32
    scf.if %15 {
      %c0_60 = arith.constant 0 : index
      %c0_61 = arith.constant 0 : index
      %c0_62 = arith.constant 0 : index
      %c0_63 = arith.constant 0 : index
      %75 = vector.load %arg4[%c0_60, %c0_61, %c0_62, %c0_63] : memref<1x1x8x64xf32, #tpu.memory_space<vmem>>, vector<1x1x8x64xf32>
      %76 = vector.shape_cast %75 : vector<1x1x8x64xf32> to vector<1x8x64xf32>
      %77 = arith.truncf %76 : vector<1x8x64xf32> to vector<1x8x64xbf16>
      %c9_64 = arith.constant 9 : index
      %c1_65 = arith.constant 1 : index
      %c0_66 = arith.constant 0 : index
      %78 = vector.load %arg7[%c9_64, %c1_65, %c0_66] : memref<10x10x64xbf16, #tpu.memory_space<vmem>>, vector<1x8x64xbf16>
      tpu.vector_store %arg7[%c9_64, %c1_65, %c0_66], %77 {strides = array<i32>} : memref<10x10x64xbf16, #tpu.memory_space<vmem>>, vector<1x8x64xbf16>,
    } else {
    }
    %cst = arith.constant 0.000000e+00 : bf16
    %16 = vector.broadcast %cst : bf16 to vector<10x1x64xbf16>
    %c0_12 = arith.constant 0 : index
    %c0_13 = arith.constant 0 : index
    %c0_14 = arith.constant 0 : index
    %17 = vector.load %arg7[%c0_12, %c0_13, %c0_14] : memref<10x10x64xbf16, #tpu.memory_space<vmem>>, vector<10x1x64xbf16>
    tpu.vector_store %arg7[%c0_12, %c0_13, %c0_14], %16 {strides = array<i32>} : memref<10x10x64xbf16, #tpu.memory_space<vmem>>, vector<10x1x64xbf16>,
    %cst_15 = arith.constant 0.000000e+00 : bf16
    %18 = vector.broadcast %cst_15 : bf16 to vector<10x1x64xbf16>
    %c0_16 = arith.constant 0 : index
    %c9 = arith.constant 9 : index
    %c0_17 = arith.constant 0 : index
    %19 = vector.load %arg7[%c0_16, %c9, %c0_17] : memref<10x10x64xbf16, #tpu.memory_space<vmem>>, vector<10x1x64xbf16>
    tpu.vector_store %arg7[%c0_16, %c9, %c0_17], %18 {strides = array<i32>} : memref<10x10x64xbf16, #tpu.memory_space<vmem>>, vector<10x1x64xbf16>,
    %c0_18 = arith.constant 0 : index
    %c0_19 = arith.constant 0 : index
    %c0_20 = arith.constant 0 : index
    %20 = vector.load %arg7[%c0_18, %c0_19, %c0_20] : memref<10x10x64xbf16, #tpu.memory_space<vmem>>, vector<10x8x64xbf16>
    %21 = vector.shape_cast %20 : vector<10x8x64xbf16> to vector<80x64xbf16>
    %22 = vector.extract_strided_slice %21 {offsets = [0, 0], sizes = [64, 64], strides = [1, 1]} : vector<80x64xbf16> to vector<64x64xbf16>
    %c0_21 = arith.constant 0 : index
    %c0_22 = arith.constant 0 : index
    %c0_23 = arith.constant 0 : index
    %23 = vector.load %arg5[%c0_21, %c0_22, %c0_23] : memref<9x64x64xbf16, #tpu.memory_space<vmem>>, vector<1x64x64xbf16>
    %24 = vector.shape_cast %23 : vector<1x64x64xbf16> to vector<64x64xbf16>
    %cst_24 = arith.constant dense<0.000000e+00> : vector<64x64xf32>
    %25 = tpu.matmul %22, %24, %cst_24 {dimension_numbers = #tpu.dot_dimension_numbers<[1], [0], [0], [1], [0, 0, 1, 1], [], []>} : vector<64x64xbf16>, vector<64x64xbf16>, vector<64x64xf32> -> vector<64x64xf32>
    %26 = vector.extract_strided_slice %21 {offsets = [8, 0], sizes = [64, 64], strides = [1, 1]} : vector<80x64xbf16> to vector<64x64xbf16>
    %c3 = arith.constant 3 : index
    %c0_25 = arith.constant 0 : index
    %c0_26 = arith.constant 0 : index
    %27 = vector.load %arg5[%c3, %c0_25, %c0_26] : memref<9x64x64xbf16, #tpu.memory_space<vmem>>, vector<1x64x64xbf16>
    %28 = vector.shape_cast %27 : vector<1x64x64xbf16> to vector<64x64xbf16>
    %cst_27 = arith.constant dense<0.000000e+00> : vector<64x64xf32>
    %29 = tpu.matmul %26, %28, %cst_27 {dimension_numbers = #tpu.dot_dimension_numbers<[1], [0], [0], [1], [0, 0, 1, 1], [], []>} : vector<64x64xbf16>, vector<64x64xbf16>, vector<64x64xf32> -> vector<64x64xf32>
    %30 = arith.addf %25, %29 : vector<64x64xf32>
    %31 = vector.extract_strided_slice %21 {offsets = [16, 0], sizes = [64, 64], strides = [1, 1]} : vector<80x64xbf16> to vector<64x64xbf16>
    %c6 = arith.constant 6 : index
    %c0_28 = arith.constant 0 : index
    %c0_29 = arith.constant 0 : index
    %32 = vector.load %arg5[%c6, %c0_28, %c0_29] : memref<9x64x64xbf16, #tpu.memory_space<vmem>>, vector<1x64x64xbf16>
    %33 = vector.shape_cast %32 : vector<1x64x64xbf16> to vector<64x64xbf16>
    %cst_30 = arith.constant dense<0.000000e+00> : vector<64x64xf32>
    %34 = tpu.matmul %31, %33, %cst_30 {dimension_numbers = #tpu.dot_dimension_numbers<[1], [0], [0], [1], [0, 0, 1, 1], [], []>} : vector<64x64xbf16>, vector<64x64xbf16>, vector<64x64xf32> -> vector<64x64xf32>
    %35 = arith.addf %30, %34 : vector<64x64xf32>
    %c0_31 = arith.constant 0 : index
    %c1_32 = arith.constant 1 : index
    %c0_33 = arith.constant 0 : index
    %36 = vector.load %arg7[%c0_31, %c1_32, %c0_33] : memref<10x10x64xbf16, #tpu.memory_space<vmem>>, vector<10x8x64xbf16>
    %37 = vector.shape_cast %36 : vector<10x8x64xbf16> to vector<80x64xbf16>
    %38 = vector.extract_strided_slice %37 {offsets = [0, 0], sizes = [64, 64], strides = [1, 1]} : vector<80x64xbf16> to vector<64x64xbf16>
    %c1_34 = arith.constant 1 : index
    %c0_35 = arith.constant 0 : index
    %c0_36 = arith.constant 0 : index
    %39 = vector.load %arg5[%c1_34, %c0_35, %c0_36] : memref<9x64x64xbf16, #tpu.memory_space<vmem>>, vector<1x64x64xbf16>
    %40 = vector.shape_cast %39 : vector<1x64x64xbf16> to vector<64x64xbf16>
    %cst_37 = arith.constant dense<0.000000e+00> : vector<64x64xf32>
    %41 = tpu.matmul %38, %40, %cst_37 {dimension_numbers = #tpu.dot_dimension_numbers<[1], [0], [0], [1], [0, 0, 1, 1], [], []>} : vector<64x64xbf16>, vector<64x64xbf16>, vector<64x64xf32> -> vector<64x64xf32>
    %42 = arith.addf %35, %41 : vector<64x64xf32>
    %43 = vector.extract_strided_slice %37 {offsets = [8, 0], sizes = [64, 64], strides = [1, 1]} : vector<80x64xbf16> to vector<64x64xbf16>
    %c4 = arith.constant 4 : index
    %c0_38 = arith.constant 0 : index
    %c0_39 = arith.constant 0 : index
    %44 = vector.load %arg5[%c4, %c0_38, %c0_39] : memref<9x64x64xbf16, #tpu.memory_space<vmem>>, vector<1x64x64xbf16>
    %45 = vector.shape_cast %44 : vector<1x64x64xbf16> to vector<64x64xbf16>
    %cst_40 = arith.constant dense<0.000000e+00> : vector<64x64xf32>
    %46 = tpu.matmul %43, %45, %cst_40 {dimension_numbers = #tpu.dot_dimension_numbers<[1], [0], [0], [1], [0, 0, 1, 1], [], []>} : vector<64x64xbf16>, vector<64x64xbf16>, vector<64x64xf32> -> vector<64x64xf32>
    %47 = arith.addf %42, %46 : vector<64x64xf32>
    %48 = vector.extract_strided_slice %37 {offsets = [16, 0], sizes = [64, 64], strides = [1, 1]} : vector<80x64xbf16> to vector<64x64xbf16>
    %c7 = arith.constant 7 : index
    %c0_41 = arith.constant 0 : index
    %c0_42 = arith.constant 0 : index
    %49 = vector.load %arg5[%c7, %c0_41, %c0_42] : memref<9x64x64xbf16, #tpu.memory_space<vmem>>, vector<1x64x64xbf16>
    %50 = vector.shape_cast %49 : vector<1x64x64xbf16> to vector<64x64xbf16>
    %cst_43 = arith.constant dense<0.000000e+00> : vector<64x64xf32>
    %51 = tpu.matmul %48, %50, %cst_43 {dimension_numbers = #tpu.dot_dimension_numbers<[1], [0], [0], [1], [0, 0, 1, 1], [], []>} : vector<64x64xbf16>, vector<64x64xbf16>, vector<64x64xf32> -> vector<64x64xf32>
    %52 = arith.addf %47, %51 : vector<64x64xf32>
    %c0_44 = arith.constant 0 : index
    %c2 = arith.constant 2 : index
    %c0_45 = arith.constant 0 : index
    %53 = vector.load %arg7[%c0_44, %c2, %c0_45] : memref<10x10x64xbf16, #tpu.memory_space<vmem>>, vector<10x8x64xbf16>
    %54 = vector.shape_cast %53 : vector<10x8x64xbf16> to vector<80x64xbf16>
    %55 = vector.extract_strided_slice %54 {offsets = [0, 0], sizes = [64, 64], strides = [1, 1]} : vector<80x64xbf16> to vector<64x64xbf16>
    %c2_46 = arith.constant 2 : index
    %c0_47 = arith.constant 0 : index
    %c0_48 = arith.constant 0 : index
    %56 = vector.load %arg5[%c2_46, %c0_47, %c0_48] : memref<9x64x64xbf16, #tpu.memory_space<vmem>>, vector<1x64x64xbf16>
    %57 = vector.shape_cast %56 : vector<1x64x64xbf16> to vector<64x64xbf16>
    %cst_49 = arith.constant dense<0.000000e+00> : vector<64x64xf32>
    %58 = tpu.matmul %55, %57, %cst_49 {dimension_numbers = #tpu.dot_dimension_numbers<[1], [0], [0], [1], [0, 0, 1, 1], [], []>} : vector<64x64xbf16>, vector<64x64xbf16>, vector<64x64xf32> -> vector<64x64xf32>
    %59 = arith.addf %52, %58 : vector<64x64xf32>
    %60 = vector.extract_strided_slice %54 {offsets = [8, 0], sizes = [64, 64], strides = [1, 1]} : vector<80x64xbf16> to vector<64x64xbf16>
    %c5 = arith.constant 5 : index
    %c0_50 = arith.constant 0 : index
    %c0_51 = arith.constant 0 : index
    %61 = vector.load %arg5[%c5, %c0_50, %c0_51] : memref<9x64x64xbf16, #tpu.memory_space<vmem>>, vector<1x64x64xbf16>
    %62 = vector.shape_cast %61 : vector<1x64x64xbf16> to vector<64x64xbf16>
    %cst_52 = arith.constant dense<0.000000e+00> : vector<64x64xf32>
    %63 = tpu.matmul %60, %62, %cst_52 {dimension_numbers = #tpu.dot_dimension_numbers<[1], [0], [0], [1], [0, 0, 1, 1], [], []>} : vector<64x64xbf16>, vector<64x64xbf16>, vector<64x64xf32> -> vector<64x64xf32>
    %64 = arith.addf %59, %63 : vector<64x64xf32>
    %65 = vector.extract_strided_slice %54 {offsets = [16, 0], sizes = [64, 64], strides = [1, 1]} : vector<80x64xbf16> to vector<64x64xbf16>
    %c8 = arith.constant 8 : index
    %c0_53 = arith.constant 0 : index
    %c0_54 = arith.constant 0 : index
    %66 = vector.load %arg5[%c8, %c0_53, %c0_54] : memref<9x64x64xbf16, #tpu.memory_space<vmem>>, vector<1x64x64xbf16>
    %67 = vector.shape_cast %66 : vector<1x64x64xbf16> to vector<64x64xbf16>
    %cst_55 = arith.constant dense<0.000000e+00> : vector<64x64xf32>
    %68 = tpu.matmul %65, %67, %cst_55 {dimension_numbers = #tpu.dot_dimension_numbers<[1], [0], [0], [1], [0, 0, 1, 1], [], []>} : vector<64x64xbf16>, vector<64x64xbf16>, vector<64x64xf32> -> vector<64x64xf32>
    %69 = arith.addf %64, %68 : vector<64x64xf32>
    %70 = vector.shape_cast %69 : vector<64x64xf32> to vector<8x8x64xf32>
    %71 = arith.truncf %70 : vector<8x8x64xf32> to vector<8x8x64xbf16>
    %c0_56 = arith.constant 0 : index
    %c0_57 = arith.constant 0 : index
    %c0_58 = arith.constant 0 : index
    %c0_59 = arith.constant 0 : index
    %72 = vector.load %arg6[%c0_56, %c0_57, %c0_58, %c0_59] : memref<1x8x8x64xbf16, #tpu.memory_space<vmem>>, vector<1x8x8x64xbf16>
    %73 = vector.shape_cast %72 : vector<1x8x8x64xbf16> to vector<8x8x64xbf16>
    %74 = vector.shape_cast %71 : vector<8x8x64xbf16> to vector<1x8x8x64xbf16>
    tpu.vector_store %arg6[%c0_56, %c0_57, %c0_58, %c0_59], %74 {strides = array<i32>} : memref<1x8x8x64xbf16, #tpu.memory_space<vmem>>, vector<1x8x8x64xbf16>,
    return
  }
  func.func @transform_0(%arg0: i32, %arg1: i32) -> (i32, i32, i32, i32) {
    %c0_i32 = arith.constant 0 : i32
    %c0_i32_0 = arith.constant 0 : i32
    %c0_i32_1 = arith.constant 0 : i32
    return %arg0, %arg1, %c0_i32, %c0_i32_0 : i32, i32, i32, i32
  }
  func.func @transform_1(%arg0: i32, %arg1: i32) -> (i32, i32, i32, i32) {
    %c8_i32 = arith.constant 8 : i32
    %0 = arith.muli %arg1, %c8_i32 : i32
    %c1_i32 = arith.constant 1 : i32
    %1 = arith.subi %0, %c1_i32 : i32
    %c0_i32 = arith.constant 0 : i32
    %2 = arith.maxsi %1, %c0_i32 : i32
    %c0_i32_0 = arith.constant 0 : i32
    %c0_i32_1 = arith.constant 0 : i32
    %c0_i32_2 = arith.constant 0 : i32
    return %arg0, %2, %c0_i32_0, %c0_i32_1 : i32, i32, i32, i32
  }
  func.func @transform_2(%arg0: i32, %arg1: i32) -> (i32, i32, i32, i32) {
    %c8_i32 = arith.constant 8 : i32
    %0 = arith.muli %arg1, %c8_i32 : i32
    %c8_i32_0 = arith.constant 8 : i32
    %1 = arith.addi %0, %c8_i32_0 : i32
    %c7_i32 = arith.constant 7 : i32
    %2 = arith.minsi %1, %c7_i32 : i32
    %c0_i32 = arith.constant 0 : i32
    %c0_i32_1 = arith.constant 0 : i32
    %c0_i32_2 = arith.constant 0 : i32
    return %arg0, %2, %c0_i32, %c0_i32_1 : i32, i32, i32, i32
  }
  func.func @transform_3(%arg0: i32, %arg1: i32) -> (i32, i32, i32) {
    %c0_i32 = arith.constant 0 : i32
    %c0_i32_0 = arith.constant 0 : i32
    %c0_i32_1 = arith.constant 0 : i32
    %c0_i32_2 = arith.constant 0 : i32
    return %c0_i32, %c0_i32_0, %c0_i32_1 : i32, i32, i32
  }
  func.func @transform_4(%arg0: i32, %arg1: i32) -> (i32, i32, i32, i32) {
    %c0_i32 = arith.constant 0 : i32
    %c0_i32_0 = arith.constant 0 : i32
    %c0_i32_1 = arith.constant 0 : i32
    return %arg0, %arg1, %c0_i32, %c0_i32_0 : i32, i32, i32, i32
  }
}

</mosaic_0001>

<bundles_post_ra>
// kernel: tpu_custom_call.1
= control target key start
LH: loop header
LB: loop body
LE: loop exit
PB: predicated region body
PF: predicated region fallthrough
CT: control target
= control target key end

     0   :  { %s3698_s0 = inlined_call_operand.hbm [shape: f32[2,8,8,64], index: 0, kind: input, shape index: {}]   ;;  %s3699_s1 = inlined_call_operand.hbm [shape: f32[2,8,8,64], index: 1, kind: input, shape index: {}]   ;;  %s3700_s2 = inlined_call_operand.hbm [shape: f32[2,8,8,64], index: 2, kind: input, shape index: {}]   ;;  %s3701_s3 = inlined_call_operand.hbm [shape: bf16[9,64,64], index: 3, kind: input, shape index: {}]   ;;  %s3702_s4 = inlined_call_operand.hbm [shape: bf16[2,8,8,64], index: 4, kind: output, shape index: {}]  }
   0x1   :  { %3720 = sst [smem:[#allocation23_spill]] %s3699_s1 }
   0x2   :  { %9 = vsyncpa [#allocation4], 0 }
   0x3   :  { %11 = vsyncpa [#allocation4 + $0x1], 0 }
   0x4   :  { %12 = vsyncpa [#allocation7], 0 }
   0x5   :  { %14 = vsyncpa [#allocation7 + $0x1], 0 }
   0x6   :  { %15 = vsyncpa [#allocation10], 0 }
   0x7   :  { %16 = vsyncpa [#allocation5], 0 }
   0x8   :  { %18 = vsyncpa [#allocation5 + $0x1], 0  ;;  %s3002_s15 = smov 0   ;;  %s3004_s16 = smov 0  }
   0x9   :  { %s3006_s17 = smov 0   ;;  %s3008_s18 = smov 0  }
   0xa   :  { %s3010_s19 = smov 0   ;;  %s3012_s20 = smov 0  }
   0xb LB: > { %3721 = sst [smem:[#allocation16_spill]] %s2943_s15  ;;  %s36_s21 = sadd.s32 1, %s2959_s19  ;;  %s2963_s20 = sphi %s3012_s20, %s24_s20   ;;  %s2959_s19 = sphi %s3010_s19, %s3764_s19   ;;  %s2955_s18 = sphi %s3008_s18, %s3763_s18   ;;  %s2951_s17 = sphi %s3006_s17, %s3762_s17   ;;  %s2947_s16 = sphi %s3004_s16, %s3766_s16   ;;  %s2943_s15 = sphi %s3002_s15, %s3765_s15  }
   0xc   : > { %3722 = sst [smem:[#allocation17_spill]] %s2951_s17  ;;  %s45_s22 = sadd.s32 1, %s2951_s17 }
   0xd   : > { %3723 = sst [smem:[#allocation18_spill]] %s2959_s19  ;;  %p38_p0 = scmp.ge.s32.totalorder %s36_s21, 2 }
   0xe   : > { %3724 = sst [smem:[#allocation19_spill]] %s2963_s20  ;;  %p3703_p1 = scmp.ne.s32.totalorder %s2951_s17, %s2947_s16 }
   0xf   : > { %p53_p2 = scmp.eq.s32.totalorder %s2963_s20, 0  ;;  %s3768_s21 = smov (%p38_p0, %s36_s21), 0 }
  0x10   : > { %3725 = sst [smem:[#allocation20_spill]] %s3768_s21  ;;  %p2654_p5 = scmp.lt.s32.totalorder %s2963_s20, 2 }
  0x11   : > { %p54_p4 = por %p53_p2, %p3703_p1  ;;  %s40_s23 = ssub.s32 %s2959_s19, %s3768_s21 }
  0x12   : > { %s3047_s24 = sand.u32 1, %s2951_s17   ;;  %p43_p6 = scmp.eq.s32.totalorder %s40_s23, 0 }
  0x13   : > { %s3050_s25 = sshll.u32 %s2959_s19, 10  ;;  %p3058_p7 = pnand %p2654_p5, %p54_p4 }
  0x14   : > { %s3056_s28 = scalar_lea.hbm %s3698_s0, %s3050_s25  ;;  %s239_s5 = sand.u32 1, %s2963_s20  }
  0x15   : > { %s3726_s29 = scalar_select %p3058_p7, 1, 0 }
  0x16   : > { %s3063_s30 = scalar_select %p43_p6, %s2951_s17, %s45_s22  }
  0x17   : > { %s3704_s6 = sshll.u32 %s3047_s24, 3  ;;  %s3728_s1 = sld [smem:[#allocation23_spill]] }
  0x18   : > { %3727 = sst [smem:[#allocation21_spill]] %s3063_s30  ;;  %s243_s10 = scalar_lea.vmem [#allocation6], %s3704_s6 }
  0x19   : > { %s256_s11 = sshll.u32 %s243_s10, 4  ;;  %s3077_s12 = scalar_lea.sflag [#allocation7], %s239_s5  ;;  %s3075_s11 = int_to_ptr.vmem [resolvable:$true] %s256_s11 }
  0x1a   : > { %p3083_p9 = pneg %p3058_p7 }
  0x1c   : > { %s3729_s14 = scalar_select %p3083_p9, 1, 0 }
  0x1d   : > { %s3071_s9 = scalar_lea.hbm %s3728_s1, %s3050_s25  ;;  %s2760_s26 = scalar_lea.hbm %s3728_s1, 2048 }
  0x1e   : > { %s2755_s13 = scalar_lea.hbm %s3071_s9, 128  ;;  %p2761_p12 = scmp.lt.u32.totalorder %s3071_s9, %s3728_s1 }
  0x1f   : > { %p2756_p8 = scmp.ne.s32.totalorder %s3071_s9, %s2755_s13  ;;  %p2762_p13 = scmp.lt.u32.totalorder %s2760_s26, %s2755_s13 }
  0x20   : > { %p2764_p2 = scmp.lt.u32.totalorder %s2755_s13, %s3071_s9 }
  0x21   : > { %p2758_p10 = pnand %p3083_p9, %p2756_p8  ;;  %p2763_p0 = por %p2762_p13, %p2761_p12 }
  0x23   : > { %p2759_p11 = pneg %p2758_p10  ;;  %p2765_p4 = por %p2764_p2, %p2763_p0 }
  0x25   : > { %p2766_p5 = pnand %p2765_p4, %p2759_p11 }
  0x27   : > { %2769 = shalt.err (!%p2766_p5)
}
  0x28   : > { %s2770_s5 = scalar_lea.vmem %s3075_s11, 128  ;;  %s2965_s8 = smov [#allocation6]  }
  0x29   : > { %p2771_p6 = scmp.ne.s32.totalorder %s3075_s11, %s2770_s5  ;;  %s2775_s10 = sshll.u32 %s2965_s8, 4  ;;  %s2776_s10 = int_to_ptr.vmem [resolvable:$false] %s2775_s10 }
  0x2a   : > { %s2777_s22 = scalar_lea.vmem %s2776_s10, 256  ;;  %p2778_p3 = scmp.lt.s32.totalorder %s3075_s11, %s2776_s10 }
  0x2b   : > { %p2773_p8 = pnand %p2771_p6, %p3083_p9  ;;  %p2779_p1 = scmp.lt.s32.totalorder %s2777_s22, %s2770_s5 }
  0x2d   : > { %p2774_p10 = pneg %p2773_p8  ;;  %p2780_p12 = por %p2779_p1, %p2778_p3 }
  0x2f   : > { %p2781_p13 = pnand %p2780_p12, %p2774_p10 }
  0x31   : > { %2784 = shalt.err (!%p2781_p13)
}
  0x32   : > { %2645 = dma.hbm_to_vmem [thread:$0]  (!%p3058_p7), %s3071_s9, 128, %s3075_s11, %s3077_s12  }
  0x33   : > { %s3108_s13 = sadd.s32 4294967295, %s2963_s20   ;;  %s2176_s23 = sadd.s32 4294967294, %s2963_s20  }
  0x34   : > { %p58_p1 = scmp.ne.s32.totalorder %s2947_s16, %s2943_s15  ;;  %p3708_p3 = scmp.eq.s32.totalorder %s3108_s13, 0 }
  0x35   : > { %p177_p11 = scmp.eq.s32.totalorder %s3108_s13, 1  ;;  %p183_p0 = scmp.eq.s32.totalorder %s2176_s23, 1 }
  0x36   : > { %p2177_p2 = scmp.ge.s32.totalorder %s2963_s20, 1  ;;  %p3118_p4 = por %p3708_p3, %p58_p1 }
  0x37   : > { %p3731_p5 = scmp.ne.s32.totalorder %s2951_s17, %s2947_s16  ;;  %p3129_p8 = por %p183_p0, %p58_p1 }
  0x38   : > { %s3730_s26 = scalar_select %p3118_p4, 1, 0 }
  0x39   : > { %p3125_p6 = por %p177_p11, %p3731_p5  ;;  %p190_p10 = scmp.lt.s32.totalorder %s2963_s20, 3 }
  0x3a   : > { %s3733_s11 = scalar_select %p3129_p8, 1, 0 }
  0x3b   : > { %s3732_s9 = scalar_select %p3125_p6, 1, 0 }
  0x3c   : > { %3734 = sst [smem:[#allocation22_spill]] %s3733_s11  ;;  %p3134_p12 = pnand %p2177_p2, %p190_p10 }
  0x3d   : > { %s2966_s7 = smov [#allocation9]   ;;  %s2180_s8 = sshll.u32 %s3047_s24, 6 }
  0x3e   : > { %s3735_s27 = scalar_select %p3134_p12, 1, 0 }
  0x3f   : > { %s202_s5 = sshll.u32 %s2966_s7, 4  ;;  %p2635_p13 = pneg %p3134_p12  ;;  %s3138_s5 = int_to_ptr.vmem [resolvable:$true] %s202_s5 }
  0x40   : > { %s220_s22 = scalar_lea.vmem [#allocation3], %s2180_s8  ;;  %s2785_s21 = scalar_lea.hbm %s3701_s3, 4608 }
  0x41   : > { %p3145_p11 = pnand %p2635_p13, %p3708_p3  ;;  %s229_s23 = sshll.u32 %s220_s22, 4  ;;  %s3149_s23 = int_to_ptr.vmem [resolvable:$true] %s229_s23 }
  0x42   : > { %p2786_p1 = scmp.ne.s32.totalorder %s3701_s3, %s2785_s21  ;;  %p2792_p10 = scmp.lt.u32.totalorder %s2785_s21, %s3701_s3 }
  0x43   : > { %p2787_p0 = pneg %p3145_p11 }
  0x45   : > { %p2788_p2 = pnand %p2787_p0, %p2786_p1 }
  0x47   : > { %p2789_p5 = pneg %p2788_p2 }
  0x49   : > { %p2794_p13 = pnand %p2792_p10, %p2789_p5 }
  0x4b   : > { %2797 = shalt.err (!%p2794_p13)
}
  0x4c   : > { %s2798_s8 = scalar_lea.vmem %s3138_s5, 4608  ;;  %p2806_p4 = scmp.lt.s32.totalorder %s3138_s5, %s3138_s5 }
  0x4d   : > { %p2799_p3 = scmp.ne.s32.totalorder %s3138_s5, %s2798_s8  ;;  %p2807_p12 = scmp.lt.s32.totalorder %s2798_s8, %s2798_s8 }
  0x4f   : > { %p2801_p8 = pnand %p2799_p3, %p2787_p0  ;;  %p2808_p7 = por %p2807_p12, %p2806_p4 }
  0x51   : > { %p2802_p6 = pneg %p2801_p8 }
  0x53   : > { %p2809_p9 = pnand %p2808_p7, %p2802_p6 }
  0x55   : > { %2812 = shalt.err (!%p2809_p9)
}
  0x56   : > { %s2967_s1 = smov 64   ;;  %s2968_s17 = smov 4  }
  0x57   : > { %2638 = dma.hbm_to_vmem [thread:$0]  (!%p3145_p11), %s3701_s3, 4608, %s3138_s5, [#allocation10], %s2967_s1, %s2967_s1, %s2968_s17  }
  0x58   : > { %s2322_s30 = sadd.s32 896, %s3050_s25  ;;  %s217_s6 = scalar_lea.sflag [#allocation4], %s3047_s24 }
  0x59   : > { %s2813_s22 = scalar_lea.hbm %s3056_s28, 1024  ;;  %p3737_p9 = scmp.ne.s32.totalorder %s3729_s14, 0 }
  0x5a   : > { %p2814_p7 = scmp.ne.s32.totalorder %s3056_s28, %s2813_s22  ;;  %s2818_s20 = scalar_lea.hbm %s3698_s0, 2048 }
  0x5b   : > { %p2819_p6 = scmp.lt.u32.totalorder %s3056_s28, %s3698_s0  ;;  %p2820_p8 = scmp.lt.u32.totalorder %s2818_s20, %s2813_s22 }
  0x5c   : > { %p2816_p3 = pnand %p2814_p7, %p3737_p9  ;;  %p2822_p1 = scmp.lt.u32.totalorder %s2813_s22, %s3056_s28 }
  0x5d   : > { %p2821_p12 = por %p2820_p8, %p2819_p6 }
  0x5e   : > { %p2817_p4 = pneg %p2816_p3 }
  0x5f   : > { %p2823_p0 = por %p2822_p1, %p2821_p12 }
  0x61   : > { %p2824_p11 = pnand %p2823_p0, %p2817_p4 }
  0x63   : > { %2827 = shalt.err (!%p2824_p11)
}
  0x64   : > { %s2828_s5 = scalar_lea.vmem %s3149_s23, 1024  ;;  %s2969_s10 = smov [#allocation3]  }
  0x65   : > { %p2829_p2 = scmp.ne.s32.totalorder %s3149_s23, %s2828_s5  ;;  %s2833_s1 = sshll.u32 %s2969_s10, 4  ;;  %s2834_s1 = int_to_ptr.vmem [resolvable:$false] %s2833_s1 }
  0x66   : > { %s2835_s15 = scalar_lea.vmem %s2834_s1, 2048  ;;  %p2836_p13 = scmp.lt.s32.totalorder %s3149_s23, %s2834_s1 }
  0x67   : > { %p2831_p5 = pnand %p2829_p2, %p3737_p9  ;;  %p2837_p7 = scmp.lt.s32.totalorder %s2835_s15, %s2828_s5 }
  0x69   : > { %p2832_p10 = pneg %p2831_p5  ;;  %p2838_p3 = por %p2837_p7, %p2836_p13 }
  0x6b   : > { %p2839_p6 = pnand %p2838_p3, %p2832_p10 }
  0x6d   : > { %2842 = shalt.err (!%p2839_p6)
}
  0x6e   : > { %s2970_s20 = smov 128   ;;  %s2971_s11 = smov 8  }
  0x6f   : > { %p3738_p4 = scmp.ne.s32.totalorder %s3726_s29, 0  ;;  %s3202_s21 = scalar_lea.hbm %s3700_s2, %s2322_s30 }
  0x70   : > { %s3739_s22 = sshll.u32 %s3047_s24, 3  ;;  %s2843_s5 = scalar_lea.hbm %s3202_s21, 128 }
  0x71   : > { %2642 = dma.hbm_to_vmem [thread:$0]  (!%p3738_p4), %s3056_s28, 1024, %s3149_s23, %s217_s6, %s2970_s20, %s2970_s20, %s2971_s11  }
  0x72   : > { %s267_s7 = scalar_lea.vmem [#allocation8], %s3739_s22  ;;  %p2844_p8 = scmp.ne.s32.totalorder %s3202_s21, %s2843_s5 }
  0x73   : > { %s280_s8 = sshll.u32 %s267_s7, 4  ;;  %s2848_s23 = scalar_lea.hbm %s3700_s2, 2048  ;;  %s281_s8 = int_to_ptr.vmem [resolvable:$true] %s280_s8 }
  0x74   : > { %p2846_p12 = pnand %p2844_p8, %p3737_p9  ;;  %p2849_p0 = scmp.lt.u32.totalorder %s3202_s21, %s3700_s2 }
  0x75   : > { %p2850_p11 = scmp.lt.u32.totalorder %s2848_s23, %s2843_s5  ;;  %p2852_p5 = scmp.lt.u32.totalorder %s2843_s5, %s3202_s21 }
  0x76   : > { %p2847_p1 = pneg %p2846_p12 }
  0x77   : > { %p2851_p2 = por %p2850_p11, %p2849_p0 }
  0x79   : > { %p2853_p10 = por %p2852_p5, %p2851_p2 }
  0x7b   : > { %p2854_p13 = pnand %p2853_p10, %p2847_p1 }
  0x7d   : > { %2857 = shalt.err (!%p2854_p13)
}
  0x7e   : > { %s2858_s24 = scalar_lea.vmem %s281_s8, 128  ;;  %s2972_s10 = smov [#allocation8]  }
  0x7f   : > { %p2859_p7 = scmp.ne.s32.totalorder %s281_s8, %s2858_s24  ;;  %s2863_s1 = sshll.u32 %s2972_s10, 4  ;;  %s2864_s1 = int_to_ptr.vmem [resolvable:$false] %s2863_s1 }
  0x80   : > { %s2865_s15 = scalar_lea.vmem %s2864_s1, 256  ;;  %p2866_p8 = scmp.lt.s32.totalorder %s281_s8, %s2864_s1 }
  0x81   : > { %p2861_p3 = pnand %p2859_p7, %p3737_p9  ;;  %p2867_p12 = scmp.lt.s32.totalorder %s2865_s15, %s2858_s24 }
  0x83   : > { %p2862_p6 = pneg %p2861_p3  ;;  %p2868_p4 = por %p2867_p12, %p2866_p8 }
  0x85   : > { %p2869_p0 = pnand %p2868_p4, %p2862_p6 }
  0x87   : > { %2872 = shalt.err (!%p2869_p0)
}
  0x88   : > { %p3740_p11 = scmp.ne.s32.totalorder %s3726_s29, 0  ;;  %p3741_p1 = scmp.ne.s32.totalorder %s3735_s27, 0 }
  0x89   : > { %s3227_s14 = sand.u32 (!%p3741_p1), 1, %s2947_s16   ;;  %p3742_p9 = scmp.ne.s32.totalorder (!%p3741_p1), %s3730_s26, 0 }
  0x8a   : > { %2648 = dma.hbm_to_vmem [thread:$0]  (!%p3740_p11), %s3202_s21, 128, %s281_s8, %s3077_s12  }
  0x8b   : > { %289 = sbr.rel (%p3741_p1) target bundleno = 520 (0x208), region = 36  ;;  %s2190_s20 = sshll.u32 (!%p3741_p1), %s3227_s14, 6 }
  0x8c   : > { %s292_s11 = scalar_lea.sflag (!%p3741_p1), [#allocation4], %s3227_s14  ;;  %s3231_s17 = scalar_lea.vmem (!%p3741_p1), [#allocation3], %s2190_s20 }
  0x92   : > { %2926 = dma.done.wait (%p3742_p9), %s292_s11, 1024  }
  0x93   : > { %2928 = vsyncadd (%p3742_p9), %s292_s11, 4294966272  ;;  %s300_s29 = sand.u32 1, %s3108_s13  }
  0x94   : > { %s301_s12 = scalar_lea.sflag [#allocation7], %s300_s29 }
  0x95   : > { %2930 = dma.done.wait (%p3742_p9), %s301_s12, 256  }
  0x96   : > { %2932 = vsyncadd (%p3742_p9), %s301_s12, 4294967040  ;;  %p3743_p4 = scmp.eq.s32.totalorder %s3108_s13, 0 }
  0x98   : > { %2934 = dma.done.wait (%p3743_p4), [#allocation10], 4608   ;;  %p3744_p2 = pmov %p3743_p4 }
  0x99   : > { %vm484_vm0 = vcmask 519168   ;;  %vm490_vm1 = vcmask 516096   ;;  %v2973_v0 = vmov 0   ;;  %v2713_v1 = vld [vmem:[#allocation9 + $0x60] sm:$0xff]   ;;  %v2714_v2 = vld [vmem:[#allocation9 + $0x68] sm:$0xff]   ;;  %v2715_v4 = vld [vmem:[#allocation9 + $0x70] sm:$0xff]  }
  0x9a   : > { %2936 = vsyncadd (%p3744_p2), [#allocation10], 4294962688  ;;  %543 = vst.msk [vmem:[#allocation2] sm:$0xf] %vm484_vm0, %v2973_v0  ;;  %2407 = vmatprep.subr.bf16.mxu1 %v2713_v1  ;;  %v2716_v3 = vld [vmem:[#allocation9 + $0x80] sm:$0xff]   ;;  %v2718_v5 = vld [vmem:[#allocation9 + $0x88] sm:$0xff]  }
  0x9b   : > { %545 = vst.msk [vmem:[#allocation2 + $0x4] sm:$0x1] %vm490_vm1, %v2973_v0  ;;  %578 = vst.msk [vmem:[#allocation2 + $0x4c] sm:$0x1] %vm490_vm1, %v2973_v0  ;;  %2408 = vmatpush3.bf16.msra.mxu1 %v2713_v1  ;;  %2471 = vmatprep.subr.bf16.mxu0 %v2716_v3  ;;  %v363_v6 = vld [vmem:[%s3231_s17] sm:$0xff]  ;;  %v364_v7 = vld [vmem:[%s3231_s17 + $0x8] sm:$0xff] }
  0x9c   : > { %576 = vst.msk [vmem:[#allocation2 + $0x48] sm:$0xf] %vm484_vm0, %v2973_v0  ;;  %2409 = vmatprep.subr.bf16.mxu1 %v2714_v2  ;;  %2472 = vmatpush3.bf16.msra.mxu0 %v2716_v3  ;;  %v365_v8 = vld [vmem:[%s3231_s17 + $0x10] sm:$0xff]  ;;  %v366_v9 = vld [vmem:[%s3231_s17 + $0x18] sm:$0xff]  ;;  %v2323_v10 = vpack.c.bf16 %v363_v6, %v363_v6  ;;  %v2324_v11 = vpack.c.bf16 %v364_v7, %v364_v7  ;;  %vm491_vm2 = vsmask.f32 256 }
  0x9d   : > { %2473 = vmatprep.subr.bf16.mxu0 %v2718_v5  ;;  %v2325_v12 = vpack.c.bf16 %v365_v8, %v365_v8  ;;  %v2717_v13 = vld [vmem:[#allocation9 + $0x78] sm:$0xff]   ;;  %v2326_v14 = vpack.c.bf16 %v366_v9, %v366_v9  ;;  %vm485_vm3 = vsmask.f32 7938  ;;  %vm3256_vm4 = vmand %vm490_vm1, %vm491_vm2  ;;  %v496_v26 = vld [vmem:[#allocation2 + $0x10] sm:$0xf]  ;;  %vm737_vm7 = vcmask 523264  }
  0x9e   : > { %v404_v16 = vshrl.u32 %v2323_v10, 16  ;;  %v407_v17 = vshll.u32 %v2323_v10, 16  ;;  %v412_v18 = vshrl.u32 %v2324_v11, 16  ;;  %v415_v19 = vshll.u32 %v2324_v11, 16  ;;  %v487_v24 = vld [vmem:[#allocation2 + $0x8] sm:$0xf]  ;;  %vm3264_vm5 = vmand %vm484_vm0, %vm485_vm3 }
  0x9f   : > { %2410 = vmatpush3.bf16.msra.mxu1 %v2714_v2  ;;  %v420_v20 = vshrl.u32 %v2325_v12, 16  ;;  %v423_v21 = vshll.u32 %v2325_v12, 16  ;;  %v428_v22 = vshrl.u32 %v2326_v14, 16  ;;  %v431_v23 = vshll.u32 %v2326_v14, 16  ;;  %v502_v30 = vld [vmem:[#allocation2 + $0x18] sm:$0xf]  ;;  %vm3325_vm6 = vmand %vm490_vm1, %vm485_vm3 }
  0xa0   : > { %2411 = vmatprep.subr.bf16.mxu1 %v2715_v4  ;;  %2474 = vmatpush3.bf16.msra.mxu0 %v2718_v5  ;;  %v406_v27 = vrot.slane %v404_v16, 7  ;;  %v3260_v28 = vrot.slane %v412_v18, 7  ;;  %v3274_v34 = vld [vmem:[#allocation9] sm:$0xff]   ;;  %v2724_v35 = vld [vmem:[#allocation9 + $0x90] sm:$0xff]   ;;  %v2726_v43 = vld [vmem:[#allocation9 + $0x98] sm:$0xff]   ;;  %vm1591_vm11 = vcmask 1042432  }
  0xa1   : > { %v605_v15 = vld [vmem:[#allocation2] sm:$0x1]  ;;  %v3270_v32 = vrot.slane %v420_v20, 7  ;;  %v3272_v33 = vrot.slane %v428_v22, 7  ;;  %2475 = vmatprep.subr.bf16.mxu0 %v2724_v35  ;;  %v367_v44 = vld [vmem:[%s3231_s17 + $0x20] sm:$0xff]  ;;  %v368_v45 = vld [vmem:[%s3231_s17 + $0x28] sm:$0xff] }
  0xa2   : > { %v606_v31 = vsel %vm3256_vm4, 0, %v605_v15  ;;  %v409_v36 = vor.u32 %v407_v17, %v406_v27  ;;  %v417_v37 = vor.u32 %v415_v19, %v3260_v28  ;;  %v508_v38 = vld [vmem:[#allocation2 + $0x20] sm:$0xf]  ;;  %v2327_v48 = vpack.c.bf16 %v367_v44, %v367_v44  ;;  %v370_v53 = vld [vmem:[%s3231_s17 + $0x38] sm:$0xff]  ;;  %v520_v60 = vld [vmem:[#allocation2 + $0x30] sm:$0xf] }
  0xa3   : > { %2412 = vmatpush3.bf16.msra.mxu1 %v2715_v4  ;;  %607 = vst [vmem:[#allocation2] sm:$0x1] %v606_v31  ;;  %v425_v39 = vor.u32 %v423_v21, %v3270_v32  ;;  %v433_v40 = vor.u32 %v431_v23, %v3272_v33  ;;  %v2328_v49 = vpack.c.bf16 %v368_v45, %v368_v45  ;;  %v369_v50 = vld [vmem:[%s3231_s17 + $0x30] sm:$0xff]  ;;  %v410_v51 = vrot.slane %v406_v27, 4  ;;  %v514_v59 = vld [vmem:[#allocation2 + $0x28] sm:$0xf] }
  0xa4   : > { %2413 = vmatprep.subr.bf16.mxu1 %v2717_v13  ;;  %v488_v41 = vsel %vm3264_vm5, %v409_v36, %v487_v24  ;;  %v497_v42 = vsel %vm3264_vm5, %v417_v37, %v496_v26  ;;  %2476 = vmatpush3.bf16.msra.mxu0 %v2724_v35  ;;  %v418_v52 = vrot.slane %v3260_v28, 4  ;;  %v2329_v54 = vpack.c.bf16 %v369_v50, %v369_v50  ;;  %v493_v3 = vld [vmem:[#allocation2 + $0xc] sm:$0x1]  ;;  %v3296_v4 = vld [vmem:[#allocation9 + $0xe0] sm:$0xff]   ;;  %v526_v8 = vld [vmem:[#allocation2 + $0x38] sm:$0xf] }
  0xa5   : > { %489 = vst [vmem:[#allocation2 + $0x8] sm:$0xf] %v488_v41  ;;  %498 = vst [vmem:[#allocation2 + $0x10] sm:$0xf] %v497_v42  ;;  %v503_v46 = vsel %vm3264_vm5, %v425_v39, %v502_v30  ;;  %v509_v47 = vsel %vm3264_vm5, %v433_v40, %v508_v38  ;;  %2477 = vmatprep.subr.bf16.mxu0 %v2726_v43  ;;  %v436_v55 = vshrl.u32 %v2327_v48, 16  ;;  %v439_v56 = vshll.u32 %v2327_v48, 16 }
  0xa6   : > { %504 = vst [vmem:[#allocation2 + $0x18] sm:$0xf] %v503_v46  ;;  %510 = vst [vmem:[#allocation2 + $0x20] sm:$0xf] %v509_v47  ;;  %v444_v57 = vshrl.u32 %v2328_v49, 16  ;;  %v447_v58 = vshll.u32 %v2328_v49, 16  ;;  %v2330_v61 = vpack.c.bf16 %v370_v53, %v370_v53  ;;  %v494_v9 = vsel %vm3256_vm4, %v410_v51, %v493_v3 }
  0xa7   : > { %2414 = vmatpush3.bf16.msra.mxu1 %v2717_v13  ;;  %v452_v62 = vshrl.u32 %v2329_v54, 16  ;;  %v455_v63 = vshll.u32 %v2329_v54, 16  ;;  %v426_v0 = vrot.slane %v3270_v32, 4  ;;  %v438_v1 = vrot.slane %v436_v55, 7  ;;  %v499_v10 = vld [vmem:[#allocation2 + $0x14] sm:$0x1] }
  0xa8   : > { %2423 = vmatprep.subr.bf16.mxu1 %v3274_v34  ;;  %2478 = vmatpush3.bf16.msra.mxu0 %v2726_v43  ;;  %v3294_v2 = vrot.slane %v444_v57, 7  ;;  %v460_v6 = vshrl.u32 %v2330_v61, 16  ;;  %v463_v7 = vshll.u32 %v2330_v61, 16  ;;  %v434_v11 = vrot.slane %v3272_v33, 4  ;;  %v532_v15 = vld [vmem:[#allocation2 + $0x40] sm:$0xf] }
  0xa9   : > { %v3298_v5 = vrot.slane %v452_v62, 7  ;;  %v441_v12 = vor.u32 %v439_v56, %v438_v1  ;;  %v442_v13 = vrot.slane %v438_v1, 4  ;;  %495 = vst [vmem:[#allocation2 + $0xc] sm:$0x1] %v494_v9  ;;  %v505_v16 = vld [vmem:[#allocation2 + $0x1c] sm:$0x1]  ;;  %2487 = vmatprep.subr.bf16.mxu0 %v3296_v4  ;;  %v500_v22 = vsel %vm3256_vm4, %v418_v52, %v499_v10 }
  0xaa   : > { %v449_v14 = vor.u32 %v447_v58, %v3294_v2  ;;  %v511_v17 = vld [vmem:[#allocation2 + $0x24] sm:$0x1]  ;;  %v3306_v21 = vrot.slane %v460_v6, 7  ;;  %501 = vst [vmem:[#allocation2 + $0x14] sm:$0x1] %v500_v22  ;;  %v506_v38 = vsel %vm3256_vm4, %v426_v0, %v505_v16  ;;  %v2725_v49 = vld [vmem:[#allocation9 + $0x8] sm:$0xff]  }
  0xab   : > { %v457_v20 = vor.u32 %v455_v63, %v3298_v5  ;;  %v515_v28 = vsel %vm3264_vm5, %v441_v12, %v514_v59  ;;  %v517_v35 = vld [vmem:[#allocation2 + $0x2c] sm:$0x1]  ;;  %v512_v39 = vsel %vm3256_vm4, %v434_v11, %v511_v17  ;;  %v636_v41 = vld [vmem:[#allocation2 + $0x4] sm:$0x1]  ;;  %507 = vst [vmem:[#allocation2 + $0x1c] sm:$0x1] %v506_v38 }
  0xac   : > { %v608_v18 = vld [vmem:[#allocation2 + $0x8] sm:$0x1]  ;;  %v611_v19 = vld [vmem:[#allocation2 + $0x10] sm:$0x1]  ;;  %v521_v30 = vsel %vm3264_vm5, %v449_v14, %v520_v60  ;;  %516 = vst [vmem:[#allocation2 + $0x28] sm:$0xf] %v515_v28  ;;  %v465_v33 = vor.u32 %v463_v7, %v3306_v21  ;;  %v518_v40 = vsel %vm3256_vm4, %v442_v13, %v517_v35 }
  0xad   : > { %v609_v23 = vsel %vm3256_vm4, 0, %v608_v18  ;;  %v612_v24 = vsel %vm3256_vm4, 0, %v611_v19  ;;  %v614_v26 = vld [vmem:[#allocation2 + $0x18] sm:$0x1]  ;;  %v617_v27 = vld [vmem:[#allocation2 + $0x20] sm:$0x1]  ;;  %v527_v37 = vsel %vm3264_vm5, %v457_v20, %v526_v8 }
  0xae   : > { %610 = vst [vmem:[#allocation2 + $0x8] sm:$0x1] %v609_v23  ;;  %613 = vst [vmem:[#allocation2 + $0x10] sm:$0x1] %v612_v24  ;;  %v615_v31 = vsel %vm3256_vm4, 0, %v614_v26  ;;  %v618_v32 = vsel %vm3256_vm4, 0, %v617_v27  ;;  %v533_v42 = vsel %vm3264_vm5, %v465_v33, %v532_v15 }
  0xaf   : > { %522 = vst [vmem:[#allocation2 + $0x30] sm:$0xf] %v521_v30  ;;  %616 = vst [vmem:[#allocation2 + $0x18] sm:$0x1] %v615_v31  ;;  %v637_v43 = vsel %vm3325_vm6, 0, %v636_v41  ;;  %v2729_v7 = vld [vmem:[#allocation9 + $0x10] sm:$0xff]  }
  0xb0   : > { %619 = vst [vmem:[#allocation2 + $0x20] sm:$0x1] %v618_v32  ;;  %528 = vst [vmem:[#allocation2 + $0x38] sm:$0xf] %v527_v37  ;;  %v639_v44 = vld [vmem:[#allocation2 + $0xc] sm:$0x1] }
  0xb1   : > { %513 = vst [vmem:[#allocation2 + $0x24] sm:$0x1] %v512_v39  ;;  %519 = vst [vmem:[#allocation2 + $0x2c] sm:$0x1] %v518_v40  ;;  %v640_v45 = vsel %vm3325_vm6, 0, %v639_v44  ;;  %v458_v16 = vrot.slane %v3298_v5, 4 }
  0xb2   : > { %534 = vst [vmem:[#allocation2 + $0x40] sm:$0xf] %v533_v42  ;;  %638 = vst [vmem:[#allocation2 + $0x4] sm:$0x1] %v637_v43  ;;  %v642_v46 = vld [vmem:[#allocation2 + $0x14] sm:$0x1] }
  0xb3   : > { %641 = vst [vmem:[#allocation2 + $0xc] sm:$0x1] %v640_v45  ;;  %v1034_v47 = vld [vmem:[#allocation2] sm:$0xf]  ;;  %v620_v50 = vld [vmem:[#allocation2 + $0x28] sm:$0x1] }
  0xb4   : > { %v621_v54 = vsel %vm3256_vm4, 0, %v620_v50  ;;  %v643_v55 = vsel %vm3325_vm6, 0, %v642_v46  ;;  %v645_v59 = vld [vmem:[#allocation2 + $0x1c] sm:$0x1]  ;;  %vm1054_vm8 = vsmask.f32 3328 }
  0xb5   : > { %v3343_v48 = vld [vmem:[#allocation2 + $0x8] sm:$0xf]  ;;  %v3345_v29 = vld [vmem:[#allocation2 + $0x10] sm:$0xf]  ;;  %622 = vst [vmem:[#allocation2 + $0x28] sm:$0x1] %v621_v54 }
  0xb6   : > { %v3347_v51 = vld [vmem:[#allocation2 + $0x18] sm:$0xf]  ;;  %v2205_v53 = vcombine.low %v3343_v48, %v3345_v29  ;;  %v623_v57 = vld [vmem:[#allocation2 + $0x30] sm:$0x1]  ;;  %644 = vst [vmem:[#allocation2 + $0x14] sm:$0x1] %v643_v55 }
  0xb7   : > { %v3349_v52 = vld [vmem:[#allocation2 + $0x20] sm:$0xf]  ;;  %v626_v58 = vld [vmem:[#allocation2 + $0x38] sm:$0x1]  ;;  %vm1055_vm9 = vsmask.f32 7440 }
  0xb8   : > { %v2206_v56 = vcombine.low %v3347_v51, %v3349_v52  ;;  %2415 = vmatprep.mubr.msk.bf16.mxu1 %vm737_vm7, %v2205_v53  ;;  %v624_v60 = vsel %vm3256_vm4, 0, %v623_v57  ;;  %v627_v61 = vsel %vm3256_vm4, 0, %v626_v58  ;;  %v646_v63 = vsel %vm3325_vm6, 0, %v645_v59  ;;  %v648_v1 = vld [vmem:[#allocation2 + $0x24] sm:$0x1]  ;;  %v2731_v24 = vld [vmem:[#allocation9 + $0x18] sm:$0xff]   ;;  %vm3409_vm10 = vmor %vm1054_vm8, %vm1055_vm9 }
  0xb9   : > { %v629_v62 = vld [vmem:[#allocation2 + $0x40] sm:$0x1]  ;;  %625 = vst [vmem:[#allocation2 + $0x30] sm:$0x1] %v624_v60  ;;  %628 = vst [vmem:[#allocation2 + $0x38] sm:$0x1] %v627_v61 }
  0xba   : > { %2416 = vmatmul.mubr.msk.bf16.vlgmr.msra.gmra.mrb[0].mxu1 %vm737_vm7, %v2206_v56  ;;  %v630_v0 = vsel %vm3256_vm4, 0, %v629_v62  ;;  %647 = vst [vmem:[#allocation2 + $0x1c] sm:$0x1] %v646_v63  ;;  %v651_v3 = vld [vmem:[#allocation2 + $0x2c] sm:$0x1]  ;;  %v1058_v6 = vshrl.u32 %v1034_v47, 16 }
  0xbb   : > { %2424 = vmatpush3.bf16.msra.mxu1 %v3274_v34  ;;  %631 = vst [vmem:[#allocation2 + $0x40] sm:$0x1] %v630_v0  ;;  %v649_v8 = vsel %vm3325_vm6, 0, %v648_v1  ;;  %v652_v9 = vsel %vm3325_vm6, 0, %v651_v3  ;;  %v1036_v10 = vld [vmem:[#allocation2 + $0x8] sm:$0xf] }
  0xbc   : > { %v1061_v11 = vshll.u32 %v1034_v47, 16  ;;  %2425 = vmatprep.subr.bf16.mxu1 %v2725_v49  ;;  %650 = vst [vmem:[#allocation2 + $0x24] sm:$0x1] %v649_v8  ;;  %653 = vst [vmem:[#allocation2 + $0x2c] sm:$0x1] %v652_v9  ;;  %v450_v34 = vrot.slane %v3294_v2, 4 }
  0xbd   : > { %v3374_v12 = vld [vmem:[#allocation2 + $0xc] sm:$0x1]  ;;  %v1038_v13 = vld [vmem:[#allocation2 + $0x10] sm:$0xf]  ;;  %v1040_v14 = vld [vmem:[#allocation2 + $0x18] sm:$0xf] }
  0xbe   : > { %v666_v15 = vld [vmem:[#allocation2] sm:$0xf]  ;;  %v1072_v17 = vshrl.u32 %v1036_v10, 16  ;;  %v1075_v18 = vshll.u32 %v1036_v10, 16  ;;  %v466_v19 = vrot.slane %v3306_v21, 4  ;;  %v3379_v20 = vrot.slane %v1058_v6, 4 }
  0xbf   : > { %v1081_v22 = vshll.u32 %v3374_v12, 16  ;;  %v1086_v23 = vshrl.u32 %v1038_v13, 16  ;;  %2426 = vmatpush3.bf16.msra.mxu1 %v2725_v49  ;;  %v3382_v26 = vld [vmem:[#allocation2 + $0x28] sm:$0xf]  ;;  %v3384_v27 = vrot.slane %v1061_v11, 5  ;;  %v1089_v28 = vshll.u32 %v1038_v13, 16 }
  0xc0   : > { %v1100_v30 = vshrl.u32 %v1040_v14, 16  ;;  %v1103_v2 = vshll.u32 %v1040_v14, 16  ;;  %2427 = vmatprep.subr.bf16.mxu1 %v2729_v7  ;;  %v3386_v31 = vld [vmem:[#allocation2 + $0x14] sm:$0x1]  ;;  %v1074_v32 = vrot.slane %v1072_v17, 4  ;;  %v1077_v33 = vrot.slane %v1075_v18, 5 }
  0xc1   : > { %v523_v35 = vld [vmem:[#allocation2 + $0x34] sm:$0x1]  ;;  %v2217_v37 = vcombine.low %v666_v15, %v3343_v48  ;;  %v3389_v38 = vld [vmem:[#allocation2 + $0x30] sm:$0xf]  ;;  %v3391_v39 = vld [vmem:[#allocation2 + $0x38] sm:$0xf]  ;;  %v3428_v18 = vcombine.low %v3345_v29, %v3347_v51 }
  0xc2   : > { %v3393_v40 = vld [vmem:[#allocation2 + $0x1c] sm:$0x1]  ;;  %v524_v41 = vsel %vm3256_vm4, %v450_v34, %v523_v35  ;;  %v2207_v42 = vcombine.low %v3382_v26, %v3389_v38  ;;  %v3399_v43 = vld [vmem:[#allocation2 + $0x40] sm:$0xf]  ;;  %v1078_v45 = vor.u32 %v1077_v33, %v1074_v32  ;;  %v1083_v46 = vrot.slane %v1081_v22, 5  ;;  %v3401_v49 = vld [vmem:[#allocation9 + $0xc0] sm:$0xff]  }
  0xc3   : > { %v1042_v44 = vld [vmem:[#allocation2 + $0x20] sm:$0xf]  ;;  %v1088_v47 = vrot.slane %v1086_v23, 4  ;;  %525 = vst [vmem:[#allocation2 + $0x34] sm:$0x1] %v524_v41  ;;  %v2208_v48 = vcombine.low %v3391_v39, %v3399_v43  ;;  %v1091_v55 = vrot.slane %v1089_v28, 5  ;;  %2428 = vmatpush3.bf16.msra.mxu1 %v2729_v7  ;;  %v3438_v33 = vcombine.low %v3349_v52, %v3382_v26 }
  0xc4   : > { %v3405_v50 = vld [vmem:[#allocation2 + $0x24] sm:$0x1]  ;;  %v1044_v53 = vld [vmem:[#allocation2 + $0x28] sm:$0xf]  ;;  %v1095_v56 = vshll.u32 %v3386_v31, 16  ;;  %2419 = vmatprep.mubr.msk.bf16.mxu1 %vm737_vm7, %v2207_v42  ;;  %v1079_v57 = vrot.slane %v1078_v45, 4  ;;  %2429 = vmatprep.subr.bf16.mxu1 %v2731_v24  ;;  %v3474_v21 = vcombine.low %v3389_v38, %v3391_v39 }
  0xc5   : > { %v1102_v58 = vrot.slane %v1100_v30, 4  ;;  %v1105_v59 = vrot.slane %v1103_v2, 5  ;;  %v1109_v60 = vshll.u32 %v3393_v40, 16  ;;  %2420 = vmatmul.mubr.msk.bf16.gmra.mrb[4].mxu1 %vm737_vm7, %v2208_v48  ;;  %v1092_v61 = vor.u32 %v1091_v55, %v1088_v47  ;;  %v3423_v13 = vld [vmem:[#allocation2 + $0x2c] sm:$0x1]  ;;  %v2732_v42 = vld [vmem:[#allocation9 + $0xe8] sm:$0xff]  }
  0xc6   : > { %v1097_v62 = vrot.slane %v1095_v56, 5  ;;  %v1114_v63 = vshrl.u32 %v1042_v44, 16  ;;  %v1117_v0 = vshll.u32 %v1042_v44, 16  ;;  %v3419_v1 = vsel %vm3409_vm10, %v1079_v57, %v1083_v46  ;;  %2431 = vmatprep.mubr.msk.bf16.mxu1 %vm737_vm7, %v2217_v37  ;;  %v1046_v34 = vld [vmem:[#allocation2 + $0x30] sm:$0xf]  ;;  %v2735_v37 = vld [vmem:[#allocation9 + $0xc8] sm:$0xff]  }
  0xc7   : > { %v1106_v3 = vor.u32 %v1105_v59, %v1102_v58  ;;  %v1111_v6 = vrot.slane %v1109_v60, 5  ;;  %v1123_v7 = vshll.u32 %v3405_v50, 16  ;;  %v1093_v8 = vrot.slane %v1092_v61, 4  ;;  %2430 = vmatpush3.bf16.msra.mxu1 %v2731_v24  ;;  %v529_v17 = vld [vmem:[#allocation2 + $0x3c] sm:$0x1]  ;;  %v2737_v48 = vld [vmem:[#allocation9 + $0xd0] sm:$0xff]  }
  0xc8   : > { %v1116_v9 = vrot.slane %v1114_v63, 4  ;;  %v1119_v10 = vrot.slane %v1117_v0, 5  ;;  %v1128_v11 = vshrl.u32 %v1044_v53, 16  ;;  %v1131_v15 = vshll.u32 %v1044_v53, 16  ;;  %2439 = vmatprep.subr.bf16.mxu1 %v3401_v49  ;;  %v535_v35 = vld [vmem:[#allocation2 + $0x44] sm:$0x1] }
  0xc9   : > { %v1107_v14 = vrot.slane %v1106_v3, 4  ;;  %v3432_v22 = vsel %vm3409_vm10, %v1093_v8, %v1097_v62  ;;  %v1125_v28 = vrot.slane %v1123_v7, 5  ;;  %v1137_v41 = vshll.u32 %v3423_v13, 16  ;;  %v1048_v45 = vld [vmem:[#allocation2 + $0x38] sm:$0xf]  ;;  %v2734_v59 = vld [vmem:[#allocation9 + $0xf0] sm:$0xff]  }
  0xca   : > { %v1120_v23 = vor.u32 %v1119_v10, %v1116_v9  ;;  %v654_v30 = vld [vmem:[#allocation2 + $0x34] sm:$0x1]  ;;  %v1130_v24 = vrot.slane %v1128_v11, 4  ;;  %v1133_v2 = vrot.slane %v1131_v15, 5  ;;  %v2250_v32 = vcombine.low %v3419_v1, %v3432_v22  ;;  %v1050_v56 = vld [vmem:[#allocation2 + $0x40] sm:$0xf] }
  0xcb   : > { %v3442_v29 = vsel %vm3409_vm10, %v1107_v14, %v1111_v6  ;;  %v655_v44 = vsel %vm3325_vm6, 0, %v654_v30  ;;  %v1142_v26 = vshrl.u32 %v1046_v34, 16  ;;  %v1145_v46 = vshll.u32 %v1046_v34, 16  ;;  %v2739_v3 = vld [vmem:[#allocation9 + $0xd8] sm:$0xff]   ;;  %v2741_v15 = vld [vmem:[#allocation9 + $0x20] sm:$0xff]   ;;  %v2743_v36 = vld [vmem:[#allocation9 + $0x28] sm:$0xff]  }
  0xcc   : > { %v1121_v51 = vrot.slane %v1120_v23, 4  ;;  %2479 = vmatprep.mubr.msk.bf16.mxu0 %vm737_vm7, %v2250_v32  ;;  %656 = vst [vmem:[#allocation2 + $0x34] sm:$0x1] %v655_v44  ;;  %v530_v47 = vsel %vm3256_vm4, %v458_v16, %v529_v17  ;;  %v1134_v53 = vor.u32 %v1133_v2, %v1130_v24  ;;  %v536_v5 = vsel %vm3256_vm4, %v466_v19, %v535_v35  ;;  %v3467_v16 = vld [vmem:[#allocation2 + $0x4] sm:$0x1]  ;;  %v2736_v11 = vld [vmem:[#allocation9 + $0xf8] sm:$0xff]  }
  0xcd   : > { %2432 = vmatmul.mubr.msk.bf16.vlgmr.msra.gmra.mrb[0].mxu1 %vm737_vm7, %v3428_v18  ;;  %531 = vst [vmem:[#allocation2 + $0x3c] sm:$0x1] %v530_v47  ;;  %v1144_v57 = vrot.slane %v1142_v26, 4  ;;  %v1147_v58 = vrot.slane %v1145_v46, 5  ;;  %537 = vst [vmem:[#allocation2 + $0x44] sm:$0x1] %v536_v5  ;;  %v1064_v17 = vor.u32 %v3384_v27, %v3379_v20 }
  0xce   : > { %v3450_v52 = vsel %vm3409_vm10, %v1121_v51, %v1125_v28  ;;  %2440 = vmatpush3.bf16.msra.mxu1 %v3401_v49  ;;  %2435 = vmatprep.mubr.msk.bf16.mxu1 %vm737_vm7, %v3438_v33  ;;  %v1156_v49 = vshrl.u32 %v1048_v45, 16  ;;  %v1067_v60 = vshll.u32 %v3467_v16, 16  ;;  %v1139_v61 = vrot.slane %v1137_v41, 5  ;;  %v632_v8 = vld [vmem:[#allocation2 + $0x48] sm:$0x1]  ;;  %s2194_s13 = sshll.u32 %s3227_s14, 5 }
  0xcf   : > { %v2251_v55 = vcombine.low %v3442_v29, %v3450_v52  ;;  %2441 = vmatprep.subr.bf16.mxu1 %v2735_v37  ;;  %v1148_v62 = vor.u32 %v1147_v58, %v1144_v57  ;;  %v1135_v63 = vrot.slane %v1134_v53, 4  ;;  %v1159_v19 = vshll.u32 %v1048_v45, 16  ;;  %v663_v14 = vld [vmem:[#allocation2 + $0x4c] sm:$0x1]  ;;  %v2745_v53 = vld [vmem:[#allocation9 + $0x30] sm:$0xff]   ;;  %s351_s26 = scalar_lea.vmem [#allocation11], %s2194_s13 }
  0xd0   : > { %v1170_v0 = vshrl.u32 %v1050_v56, 16  ;;  %v1158_v6 = vrot.slane %v1156_v49, 4  ;;  %v1173_v7 = vshll.u32 %v1050_v56, 16  ;;  %v664_v34 = vsel %vm3325_vm6, 0, %v663_v14  ;;  %s2333_s27 = sshll.u32 %s2955_s18, 9  ;;  %s2031_s19 = sshll.u32 %s351_s26, 4  ;;  %s3646_s19 = int_to_ptr.vmem [resolvable:$true] %s2031_s19 }
  0xd1   : > { %2480 = vmatmul.mubr.msk.bf16.vlgmr.msra.gmra.mrb[0].mxu0 %vm737_vm7, %v2251_v55  ;;  %v1149_v10 = vrot.slane %v1148_v62, 4  ;;  %v1161_v23 = vrot.slane %v1159_v19, 5  ;;  %665 = vst [vmem:[#allocation2 + $0x4c] sm:$0x1] %v664_v34  ;;  %v3491_v28 = vsel %vm3409_vm10, %v1135_v63, %v1139_v61  ;;  %v1065_v51 = vrot.slane %v1064_v17, 4  ;;  %v2747_v62 = vld [vmem:[#allocation9 + $0x38] sm:$0xff]   ;;  %s3644_s7 = scalar_lea.hbm %s3702_s4, %s2333_s27 }
  0xd2   : > { %2488 = vmatpush3.bf16.msra.mxu0 %v3296_v4  ;;  %2442 = vmatpush3.bf16.msra.mxu1 %v2735_v37  ;;  %v633_v4 = vsel %vm3256_vm4, 0, %v632_v8  ;;  %v1172_v2 = vrot.slane %v1170_v0, 4  ;;  %v1175_v27 = vrot.slane %v1173_v7, 5  ;;  %v3503_v37 = vld [vmem:[#allocation9 + $0x40] sm:$0xff]   ;;  %v1069_v41 = vrot.slane %v1067_v60, 5  ;;  %s2016_s18 = scalar_lea.sflag [#allocation5], %s3227_s14 }
  0xd3   : > { %2489 = vmatprep.subr.bf16.mxu0 %v2732_v42  ;;  %2443 = vmatprep.subr.bf16.mxu1 %v2737_v48  ;;  %v3476_v9 = vld [vmem:[#allocation2 + $0x34] sm:$0x1]  ;;  %634 = vst [vmem:[#allocation2 + $0x48] sm:$0x1] %v633_v4  ;;  %v1562_v7 = vld [vmem:[#allocation2 + $0x8] sm:$0xe]  ;;  %v2240_v4 = vcombine.low %v3450_v52, %v3491_v28 }
  0xd4   : > { %v1151_v38 = vshll.u32 %v3476_v9, 16  ;;  %v657_v39 = vld [vmem:[#allocation2 + $0x3c] sm:$0x1]  ;;  %v660_v24 = vld [vmem:[#allocation2 + $0x44] sm:$0x1]  ;;  %v1070_v46 = vsel %vm3409_vm10, %v1065_v51, %v1069_v41  ;;  %vm1592_vm12 = vcmask 1046532  }
  0xd5   : > { %2436 = vmatmul.mubr.msk.bf16.gmra.mrb[4].mxu1 %vm737_vm7, %v3474_v21  ;;  %v658_v25 = vsel %vm3325_vm6, 0, %v657_v39  ;;  %v661_v20 = vsel %vm3325_vm6, 0, %v660_v24  ;;  %v2238_v49 = vcombine.low %v1070_v46, %v3419_v1  ;;  %v1567_v8 = vld [vmem:[#allocation2 + $0x30] sm:$0xe]  ;;  %v1596_v14 = vrot.slane %v3467_v16, 5  ;;  %vm3550_vm13 = vmor %vm1591_vm11, %vm1592_vm12  ;;  %v2740_v52 = vld [vmem:[#allocation9 + $0x48] sm:$0xff]  }
  0xd6   : > { %2490 = vmatpush3.bf16.msra.mxu0 %v2732_v42  ;;  %2444 = vmatpush3.bf16.msra.mxu1 %v2737_v48  ;;  %v1153_v30 = vrot.slane %v1151_v38, 5  ;;  %659 = vst [vmem:[#allocation2 + $0x3c] sm:$0x1] %v658_v25  ;;  %662 = vst [vmem:[#allocation2 + $0x44] sm:$0x1] %v661_v20  ;;  %v1176_v42 = vor.u32 %v1175_v27, %v1172_v2  ;;  %v1600_v38 = vrot.slane %v3374_v12, 5 }
  0xd7   : > { %2491 = vmatprep.subr.bf16.mxu0 %v2734_v59  ;;  %2445 = vmatprep.subr.bf16.mxu1 %v2739_v3  ;;  %v1620_v16 = vrot.slane %v3476_v9, 5  ;;  %v3559_v2 = vld [vmem:[#allocation9 + $0x110] sm:$0xff]   ;;  %v1570_v20 = vld [vmem:[#allocation2 + $0x48] sm:$0xe]  ;;  %v1564_v27 = vld [vmem:[#allocation2 + $0x18] sm:$0xe] }
  0xd8   : > { %2447 = vmatprep.mubr.msk.bf16.mxu1 %vm737_vm7, %v3428_v18  ;;  %v3499_v32 = vsel %vm3409_vm10, %v1149_v10, %v1153_v30  ;;  %v1162_v18 = vor.u32 %v1161_v23, %v1158_v6  ;;  %v3531_v1 = vld [vmem:[#allocation2 + $0x4c] sm:$0x1]  ;;  %v1561_v6 = vld [vmem:[#allocation2] sm:$0xe]  ;;  %v1568_v10 = vld [vmem:[#allocation2 + $0x38] sm:$0xe] }
  0xd9   : > { %v2252_v35 = vcombine.low %v3491_v28, %v3499_v32  ;;  %v2271_v39 = vrot.slane %v1561_v6, 9  ;;  %v2272_v23 = vrot.slane %v1562_v7, 9  ;;  %v2277_v28 = vrot.slane %v1567_v8, 9  ;;  %v1569_v41 = vld [vmem:[#allocation2 + $0x40] sm:$0xe]  ;;  %v3583_v46 = vld [vmem:[#allocation9 + $0x118] sm:$0xff]  }
  0xda   : > { %2492 = vmatpush3.bf16.msra.mxu0 %v2734_v59  ;;  %2446 = vmatpush3.bf16.msra.mxu1 %v2739_v3  ;;  %v1052_v44 = vld [vmem:[#allocation2 + $0x48] sm:$0xf]  ;;  %v1163_v47 = vrot.slane %v1162_v18, 4  ;;  %v3534_v3 = vld [vmem:[#allocation9 + $0x100] sm:$0xff]   ;;  %v2278_v12 = vrot.slane %v1568_v10, 9  ;;  %v2742_v18 = vld [vmem:[#allocation9 + $0x50] sm:$0xff]  }
  0xdb   : > { %2493 = vmatprep.subr.bf16.mxu0 %v2736_v11  ;;  %2455 = vmatprep.subr.bf16.mxu1 %v2741_v15  ;;  %v675_v26 = vld [vmem:[#allocation2 + $0x48] sm:$0xf]  ;;  %v1184_v56 = vshrl.u32 %v1052_v44, 16  ;;  %v1187_v5 = vshll.u32 %v1052_v44, 16  ;;  %v1597_v51 = vsel %vm3550_vm13, %v2271_v39, %v1596_v14  ;;  %v2280_v54 = vrot.slane %v1570_v20, 9  ;;  %s2873_s8 = scalar_lea.vmem %s3646_s19, 512 }
  0xdc   : > { %2483 = vmatprep.mubr.msk.bf16.mxu0 %vm737_vm7, %v2252_v35  ;;  %v2229_v59 = vcombine.low %v3399_v43, %v675_v26  ;;  %v3570_v35 = vsel %vm3550_vm13, %v2272_v23, %v1600_v38  ;;  %v2274_v44 = vrot.slane %v1564_v27, 9  ;;  %v1566_v26 = vld [vmem:[#allocation2 + $0x28] sm:$0xe]  ;;  %p2874_p5 = scmp.ne.s32.totalorder %s3646_s19, %s2873_s8  ;;  %p3755_p10 = scmp.ne.s32.totalorder %s3732_s9, 0 }
  0xdd   : > { %2448 = vmatmul.mubr.msk.bf16.vlgmr.msra.gmra.mrb[0].mxu1 %vm737_vm7, %v3438_v33  ;;  %v3508_v45 = vld [vmem:[#allocation2 + $0x3c] sm:$0x1]  ;;  %v3516_v55 = vld [vmem:[#allocation2 + $0x44] sm:$0x1]  ;;  %v1177_v33 = vrot.slane %v1176_v42, 4  ;;  %v1186_v19 = vrot.slane %v1184_v56, 4 }
  0xde   : > { %2494 = vmatpush3.bf16.msra.mxu0 %v2736_v11  ;;  %2456 = vmatpush3.bf16.msra.mxu1 %v2741_v15  ;;  %v1165_v48 = vshll.u32 %v3508_v45, 16  ;;  %v1179_v58 = vshll.u32 %v3516_v55, 16  ;;  %v1189_v0 = vrot.slane %v1187_v5, 5  ;;  %v3540_v11 = vld [vmem:[#allocation9 + $0x108] sm:$0xff]   ;;  %v1563_v15 = vld [vmem:[#allocation2 + $0x10] sm:$0xe]  ;;  %p2875_p13 = pnand %p2874_p5, %p3755_p10 }
  0xdf   : > { %2503 = vmatprep.subr.bf16.mxu0 %v3503_v37  ;;  %2457 = vmatprep.subr.bf16.mxu1 %v2743_v36  ;;  %v1624_v24 = vrot.slane %v3508_v45, 5  ;;  %v1632_v42 = vrot.slane %v3531_v1, 5  ;;  %v1565_v45 = vld [vmem:[#allocation2 + $0x20] sm:$0xe]  ;;  %v1608_v56 = vrot.slane %v3393_v40, 5  ;;  %s2974_s5 = smov [#allocation11]  }
  0xe0   : > { %2451 = vmatprep.mubr.msk.bf16.mxu1 %vm737_vm7, %v3474_v21  ;;  %v1167_v57 = vrot.slane %v1165_v48, 5  ;;  %v1181_v61 = vrot.slane %v1179_v58, 5  ;;  %v2239_v21 = vcombine.low %v3432_v22, %v3442_v29  ;;  %v1190_v22 = vor.u32 %v1189_v0, %v1186_v19  ;;  %p2876_p7 = pneg %p2875_p13  ;;  %s2877_s28 = sshll.u32 %s2974_s5, 4  ;;  %s2878_s28 = int_to_ptr.vmem [resolvable:$false] %s2877_s28 }
  0xe1   : > { %v1193_v29 = vshll.u32 %v3531_v1, 16  ;;  %v1612_v58 = vrot.slane %v3405_v50, 5  ;;  %v1633_v40 = vsel %vm3550_vm13, %v2280_v54, %v1632_v42  ;;  %v2749_v1 = vld [vmem:[#allocation9 + $0xb0] sm:$0xff]   ;;  %s2879_s25 = scalar_lea.vmem %s2878_s28, 1024  ;;  %p2880_p3 = scmp.lt.s32.totalorder %s3646_s19, %s2878_s28 }
  0xe2   : > { %2458 = vmatpush3.bf16.msra.mxu1 %v2743_v36  ;;  %v1168_v60 = vsel %vm3409_vm10, %v1163_v47, %v1167_v57  ;;  %v3527_v63 = vsel %vm3409_vm10, %v1177_v33, %v1181_v61  ;;  %v1191_v17 = vrot.slane %v1190_v22, 4  ;;  %v3574_v36 = vsel %vm3550_vm13, %v2277_v28, %v1620_v16  ;;  %p2881_p6 = scmp.lt.s32.totalorder %s2879_s25, %s2873_s8 }
  0xe3   : > { %2459 = vmatprep.subr.bf16.mxu1 %v2745_v53  ;;  %v2253_v43 = vcombine.low %v1168_v60, %v3527_v63  ;;  %v2241_v34 = vcombine.low %v3499_v32, %v1168_v60  ;;  %v1195_v25 = vrot.slane %v1193_v29, 5  ;;  %v2273_v32 = vrot.slane %v1563_v15, 9  ;;  %v2751_v29 = vld [vmem:[#allocation9 + $0xb8] sm:$0xff]  }
  0xe4   : > { %v1604_v47 = vrot.slane %v3386_v31, 5  ;;  %v1628_v33 = vrot.slane %v3516_v55, 5  ;;  %v2281_v57 = vcombine.low %v1597_v51, %v3570_v35  ;;  %v2275_v31 = vrot.slane %v1565_v45, 9  ;;  %p2882_p8 = por %p2881_p6, %p2880_p3 }
  0xe5   : > { %2452 = vmatmul.mubr.msk.bf16.gmra.mrb[4].mxu1 %vm737_vm7, %v2229_v59  ;;  %2484 = vmatmul.mubr.msk.bf16.gmra.mrb[4].mxu0 %vm737_vm7, %v2253_v43  ;;  %v1196_v9 = vsel %vm3409_vm10, %v1191_v17, %v1195_v25  ;;  %v2744_v59 = vld [vmem:[#allocation9 + $0x58] sm:$0xff]   ;;  %v1616_v60 = vrot.slane %v3423_v13, 5  ;;  %v1609_v13 = vsel %vm3550_vm13, %v2274_v44, %v1608_v56  ;;  %v2748_v43 = vld [vmem:[#allocation9 + $0xa8] sm:$0xff]  }
  0xe6   : > { %2460 = vmatpush3.bf16.msra.mxu1 %v2745_v53  ;;  %2463 = vmatprep.mubr.msk.bf16.mxu1 %vm737_vm7, %v2238_v49  ;;  %v2262_v48 = vcombine.low %v3527_v63, %v1196_v9  ;;  %v2279_v53 = vrot.slane %v1569_v41, 9  ;;  %v2276_v49 = vrot.slane %v1566_v26, 9  ;;  %v1605_v55 = vsel %vm3550_vm13, %v2273_v32, %v1604_v47  ;;  %p2883_p12 = pnand %p2882_p8, %p2876_p7 }
  0xe7   : > { %2461 = vmatprep.subr.bf16.mxu1 %v2747_v62  ;;  %2495 = vmatprep.mubr.msk.bf16.mxu0 %vm737_vm7, %v2239_v21  ;;  %v2282_v19 = vcombine.low %v1605_v55, %v1609_v13  ;;  %v2293_v22 = vcombine.low %v3570_v35, %v1605_v55 }
  0xe8   : > { %v1629_v50 = vsel %vm3550_vm13, %v2279_v53, %v1628_v33  ;;  %v1617_v63 = vsel %vm3550_vm13, %v2276_v49, %v1616_v60 }
  0xe9   : > { %v2305_v61 = vcombine.low %v1629_v50, %v1633_v40  ;;  %v2295_v7 = vcombine.low %v1617_v63, %v3574_v36 }
  0xea   : > { %2462 = vmatpush3.bf16.msra.mxu1 %v2747_v62  ;;  %v2746_v62 = vld [vmem:[#allocation9 + $0xa0] sm:$0xff]  }
  0xeb   : > { %2551 = vmatprep.subr.bf16.mxu1 %v3534_v3 }
  0xed   : > { %2464 = vmatmul.mubr.msk.bf16.vlgmr.msra.gmra.mrb[0].mxu1 %vm737_vm7, %v2239_v21  ;;  %2496 = vmatmul.mubr.msk.bf16.vlgmr.msra.gmra.mrb[0].mxu0 %vm737_vm7, %v2240_v4  ;;  %v1613_v21 = vsel %vm3550_vm13, %v2275_v31, %v1612_v58 }
  0xee   : > { %2555 = vmatpush3.bf16.msra.mxu1 %v3534_v3  ;;  %2467 = vmatprep.mubr.msk.bf16.mxu1 %vm737_vm7, %v2240_v4  ;;  %v2283_v0 = vcombine.low %v1613_v21, %v1617_v63  ;;  %v2294_v6 = vcombine.low %v1609_v13, %v1613_v21 }
  0xef   : > { %2552 = vmatprep.subr.bf16.mxu1 %v3540_v11  ;;  %2504 = vmatpush3.bf16.msra.mxu0 %v3503_v37  ;;  %v3578_v37 = vsel %vm3550_vm13, %v2278_v12, %v1624_v24 }
  0xf0   : > { %2499 = vmatprep.mubr.msk.bf16.mxu0 %vm737_vm7, %v2241_v34  ;;  %2505 = vmatprep.subr.bf16.mxu0 %v2740_v52  ;;  %v2284_v5 = vcombine.low %v3574_v36, %v3578_v37  ;;  %v2296_v8 = vcombine.low %v3578_v37, %v1629_v50 }
  0xf2   : > { %2556 = vmatpush3.bf16.msra.mxu1 %v3540_v11 }
  0xf3   : > { %2553 = vmatprep.subr.bf16.mxu1 %v3559_v2  ;;  %2506 = vmatpush3.bf16.msra.mxu0 %v2740_v52 }
  0xf4   : > { %2507 = vmatprep.subr.bf16.mxu0 %v2742_v18 }
  0xf5   : > { %2468 = vmatmul.mubr.msk.bf16.gmra.mrb[4].mxu1 %vm737_vm7, %v2241_v34  ;;  %2500 = vmatmul.mubr.msk.bf16.gmra.mrb[4].mxu0 %vm737_vm7, %v2262_v48 }
  0xf6   : > { %2557 = vmatpush3.bf16.msra.mxu1 %v3559_v2  ;;  %2547 = vmatprep.mubr.msk.bf16.mxu1 %vm737_vm7, %v2284_v5 }
  0xf7   : > { %2554 = vmatprep.subr.bf16.mxu1 %v3583_v46  ;;  %2508 = vmatpush3.bf16.msra.mxu0 %v2742_v18 }
  0xf8   : > { %2511 = vmatprep.mubr.msk.bf16.mxu0 %vm737_vm7, %v2281_v57  ;;  %2509 = vmatprep.subr.bf16.mxu0 %v2744_v59 }
  0xfa   : > { %2558 = vmatpush3.bf16.msra.mxu1 %v3583_v46 }
  0xfb   : > { %2510 = vmatpush3.bf16.msra.mxu0 %v2744_v59 }
  0xfc   : > { %2519 = vmatprep.subr.bf16.mxu0 %v2746_v62 }
  0xfd   : > { %2548 = vmatmul.mubr.msk.bf16.vlgmr.msra.gmra.mrb[8].mxu1 %vm737_vm7, %v2305_v61 }
  0xfe   : > { %2512 = vmatmul.mubr.msk.bf16.vlgmr.msra.gmra.mrb[0].mxu0 %vm737_vm7, %v2282_v19 }
  0xff   : > { %2520 = vmatpush3.bf16.msra.mxu0 %v2746_v62  ;;  %2515 = vmatprep.mubr.msk.bf16.mxu0 %vm737_vm7, %v2283_v0 }
 0x100   : > { %2521 = vmatprep.subr.bf16.mxu0 %v2748_v43 }
 0x103   : > { %2522 = vmatpush3.bf16.msra.mxu0 %v2748_v43 }
 0x104   : > { %2523 = vmatprep.subr.bf16.mxu0 %v2749_v1 }
 0x106   : > { %2516 = vmatmul.mubr.msk.bf16.gmra.mrb[4].mxu0 %vm737_vm7, %v2284_v5 }
 0x107   : > { %2524 = vmatpush3.bf16.msra.mxu0 %v2749_v1  ;;  %2527 = vmatprep.mubr.msk.bf16.mxu0 %vm737_vm7, %v2293_v22 }
 0x108   : > { %2525 = vmatprep.subr.bf16.mxu0 %v2751_v29 }
 0x10b   : > { %2526 = vmatpush3.bf16.msra.mxu0 %v2751_v29 }
 0x10c   : > { %2535 = vmatprep.subr.bf16.mxu0 %v3534_v3 }
 0x10e   : > { %2528 = vmatmul.mubr.msk.bf16.vlgmr.msra.gmra.mrb[0].mxu0 %vm737_vm7, %v2294_v6 }
 0x10f   : > { %2536 = vmatpush3.bf16.msra.mxu0 %v3534_v3  ;;  %2531 = vmatprep.mubr.msk.bf16.mxu0 %vm737_vm7, %v2295_v7 }
 0x110   : > { %2537 = vmatprep.subr.bf16.mxu0 %v3540_v11 }
 0x113   : > { %2538 = vmatpush3.bf16.msra.mxu0 %v3540_v11 }
 0x114   : > { %2539 = vmatprep.subr.bf16.mxu0 %v3559_v2 }
 0x116   : > { %2532 = vmatmul.mubr.msk.bf16.gmra.mrb[4].mxu0 %vm737_vm7, %v2296_v8 }
 0x117   : > { %2540 = vmatpush3.bf16.msra.mxu0 %v3559_v2  ;;  %2543 = vmatprep.mubr.msk.bf16.mxu0 %vm737_vm7, %v2282_v19 }
 0x118   : > { %2541 = vmatprep.subr.bf16.mxu0 %v3583_v46 }
 0x11b   : > { %2542 = vmatpush3.bf16.msra.mxu0 %v3583_v46 }
 0x11e   : > { %2544 = vmatmul.mubr.msk.bf16.vlgmr.msra.gmra.mrb[0].mxu0 %vm737_vm7, %v2283_v0 }
 0x1c0   : > { %v2465_v3 = vpop.f32.mrb[0].mxu1 }
 0x1c1   : > { %v1288_v10 = vpop.f32.mrb[1].mxu1 }
 0x1c2   : > { %v2466_v4 = vpop.f32.mrb[2].mxu1 }
 0x1c3   : > { %v1291_v14 = vpop.f32.mrb[3].mxu1 }
 0x1c8   : > { %v2469_v11 = vpop.f32.mrb[4].mxu1 }
 0x1c9   : > { %v1304_v38 = vpop.f32.mrb[5].mxu1 }
 0x1ca   : > { %v2470_v39 = vpop.f32.mrb[6].mxu1 }
 0x1cb   : > { %v1307_v15 = vpop.f32.mrb[7].mxu1 }
 0x1d0   : > { %v2549_v34 = vpop.f32.mrb[8].mxu1 }
 0x1d1   : > { %v1975_v17 = vpop.f32.mrb[9].mxu1 }
 0x1d2   : > { %v2550_v25 = vpop.f32.mrb[10].mxu1 }
 0x1d3   : > { %v1978_v23 = vpop.f32.mrb[11].mxu1 }
 0x1e9   : > { %v2533_v30 = vpop.f32.mrb[4].mxu0 }
 0x1ea   : > { %v2563_v52 = vadd.f32 %v2533_v30, %v2469_v11  ;;  %v1864_v28 = vpop.f32.mrb[5].mxu0 }
 0x1eb   : > { %v2565_v16 = vadd.f32 %v1864_v28, %v1304_v38  ;;  %v2534_v12 = vpop.f32.mrb[6].mxu0 }
 0x1ec   : > { %v2567_v24 = vadd.f32 %v2534_v12, %v2470_v39  ;;  %v2564_v2 = vadd.f32 %v2563_v52, %v2549_v34  ;;  %v1867_v20 = vpop.f32.mrb[7].mxu0 }
 0x1ed   : > { %v2569_v27 = vadd.f32 %v1867_v20, %v1307_v15  ;;  %v2566_v32 = vadd.f32 %v2565_v16, %v1975_v17 }
 0x1ee   : > { %v2004_v9 = vpack.c.bf16 %v2564_v2, %v2564_v2  ;;  %v2568_v51 = vadd.f32 %v2567_v24, %v2550_v25 }
 0x1ef   : > { %v2002_v35 = vpack.c.bf16 %v2566_v32, %v2566_v32  ;;  %v2570_v41 = vadd.f32 %v2569_v27, %v1978_v23 }
 0x1f0   : > { %2013 = vst.msk [vmem:[%s351_s26 + $0x18] sm:$0xf] %vm484_vm0, %v2004_v9  ;;  %v2005_v18 = vpack.c.bf16 %v2568_v51, %v2568_v51 }
 0x1f1   : > { %2011 = vst.msk [vmem:[%s351_s26 + $0x10] sm:$0xf] %vm484_vm0, %v2002_v35  ;;  %v2003_v36 = vpack.c.bf16 %v2570_v41, %v2570_v41  ;;  %v2545_v37 = vpop.f32.mrb[0].mxu0 }
 0x1f2   : > { %2014 = vst.msk [vmem:[%s351_s26 + $0x1c] sm:$0xf] %vm484_vm0, %v2005_v18  ;;  %v2559_v54 = vadd.f32 %v2545_v37, %v2465_v3  ;;  %v1959_v42 = vpop.f32.mrb[1].mxu0 }
 0x1f3   : > { %2012 = vst.msk [vmem:[%s351_s26 + $0x14] sm:$0xf] %vm484_vm0, %v2003_v36  ;;  %v2560_v44 = vadd.f32 %v1959_v42, %v1288_v10  ;;  %v2546_v45 = vpop.f32.mrb[2].mxu0 }
 0x1f4   : > { %v2000_v26 = vpack.c.bf16 %v2559_v54, %v2559_v54  ;;  %v2561_v46 = vadd.f32 %v2546_v45, %v2466_v4  ;;  %v1962_v47 = vpop.f32.mrb[3].mxu0 }
 0x1f5   : > { %v1998_v48 = vpack.c.bf16 %v2560_v44, %v2560_v44  ;;  %v2562_v53 = vadd.f32 %v1962_v47, %v1291_v14 }
 0x1f6   : > { %2009 = vst.msk [vmem:[%s351_s26 + $0x8] sm:$0xf] %vm484_vm0, %v2000_v26  ;;  %v2001_v33 = vpack.c.bf16 %v2561_v46, %v2561_v46 }
 0x1f7   : > { %2007 = vst.msk [vmem:[%s351_s26] sm:$0xf] %vm484_vm0, %v1998_v48  ;;  %v1999_v56 = vpack.c.bf16 %v2562_v53, %v2562_v53 }
 0x1f8   : > { %2010 = vst.msk [vmem:[%s351_s26 + $0xc] sm:$0xf] %vm484_vm0, %v2001_v33 }
 0x1f9   : > { %2008 = vst.msk [vmem:[%s351_s26 + $0x4] sm:$0xf] %vm484_vm0, %v1999_v56 }
 0x1fa   : > { %2886 = shalt.err (!%p2883_p12)
}
 0x1fb   : > { %s2887_s23 = scalar_lea.hbm %s3644_s7, 512  ;;  %s2891_s24 = scalar_lea.hbm %s3702_s4, 1024 }
 0x1fc   : > { %p2888_p0 = scmp.ne.s32.totalorder %s3644_s7, %s2887_s23  ;;  %p2892_p9 = scmp.lt.u32.totalorder %s3644_s7, %s3702_s4 }
 0x1fd   : > { %p2893_p4 = scmp.lt.u32.totalorder %s2891_s24, %s2887_s23  ;;  %p2895_p5 = scmp.lt.u32.totalorder %s2887_s23, %s3644_s7 }
 0x1fe   : > { %p2889_p11 = pnand %p2888_p0, %p3755_p10 }
 0x1ff   : > { %p2894_p2 = por %p2893_p4, %p2892_p9 }
 0x200   : > { %p2890_p1 = pneg %p2889_p11 }
 0x201   : > { %p2896_p13 = por %p2895_p5, %p2894_p2 }
 0x203   : > { %p2897_p7 = pnand %p2896_p13, %p2890_p1 }
 0x205   : > { %2900 = shalt.err (!%p2897_p7)
}
 0x206   : > { %s2975_s15 = smov 64   ;;  %s2976_s20 = smov 4  }
 0x207   : > { %2633 = dma.vmem_to_hbm [thread:$0]  (%p3755_p10), %s3646_s19, 512, %s3644_s7, %s2016_s18, %s2975_s15, %s2975_s15, %s2976_s20  }
 0x208 PF: > { %s3756_s11 = sld [smem:[#allocation16_spill]]  ;;  %s3757_s17 = sld [smem:[#allocation22_spill]] }
 0x209   : > { %s3758_s29 = sld [smem:[#allocation19_spill]] }
 0x20e   : > { %s2046_s12 = sand.u32 1, %s3756_s11   ;;  %p3759_p3 = scmp.ne.s32.totalorder %s3757_s17, 0 }
 0x20f   : > { %p3760_p6 = scmp.ge.s32.totalorder %s3758_s29, 2  ;;  %s2047_s13 = scalar_lea.sflag [#allocation5], %s2046_s12 }
 0x211   : > { %p2650_p8 = pnand %p3760_p6, %p3759_p3 }
 0x213   : > { %2938 = dma.done.wait (!%p2650_p8), %s2047_s13, 512  }
 0x214   : > { %2940 = vsyncadd (!%p2650_p8), %s2047_s13, 4294966784  ;;  %s24_s20 = sadd.s32 1, %s3758_s29   ;;  %s3761_s26 = sld [smem:[#allocation17_spill]] }
 0x215   : > { %p21_p12 = scmp.ge.s32.totalorder %s24_s20, 4   ;;  %s3762_s17 = sld [smem:[#allocation21_spill]] }
 0x216   : > { %s3763_s18 = sld [smem:[#allocation18_spill]]  ;;  %s3764_s19 = sld [smem:[#allocation20_spill]] }
 0x217   : > { %s3765_s15 = smov %s2947_s16  ;;  %23 = sbr.rel (!%p21_p12) target bundleno = 11 (0xb), region = 136 }
 0x21a   : > { %s3766_s16 = smov %s3761_s26 }
 0x21e   :  { %2052 = vsyncpa [#allocation4], 1 }
 0x21f   :  { %2054 = vsyncpa [#allocation4 + $0x1], 1 }
 0x220   :  { %2055 = vsyncpa [#allocation7], 1 }
 0x221   :  { %2057 = vsyncpa [#allocation7 + $0x1], 1 }
 0x222   :  { %2058 = vsyncpa [#allocation10], 1 }
 0x223   :  { %2059 = vsyncpa [#allocation5], 1 }
 0x224   :  { %2061 = vsyncpa [#allocation5 + $0x1], 1 }

</bundles_post_ra>
